<compile_context>
chip_gen: v6e
topology: v6e:2x2x1
jax: 0.10.0
libtpu: 0.0.40
codegen_flags: <defaults>
</compile_context>

<pallas_src>
import functools
import math

import jax
import jax.numpy as jnp
from jax.experimental import pallas as pl
from jax.experimental.pallas import tpu as pltpu


# ---------------------------------------------------------------------------
# Fused BasicBlock Pallas kernel
# ---------------------------------------------------------------------------
def _ds(start, size, stride):
    return pl.ds(start, size) if stride == 1 else pl.ds(start, size, stride)


def _im2col(pad_ref, KH, KW, stride, H_out, W_out, C):
    """Gather the KH*KW shifted taps from a zero-padded VMEM scratch into a single
    (H_out*W_out, KH*KW*C) patch matrix so the conv is one MXU contraction."""
    taps = []
    for ky in range(KH):
        for kx in range(KW):
            t = pad_ref[_ds(ky, H_out, stride), _ds(kx, W_out, stride), :]
            taps.append(t.reshape(H_out * W_out, C))
    return jnp.concatenate(taps, axis=-1)


def _fused_basic_block_kernel(x_ref, s1_ref, b1_ref, w1_ref, s2_ref, b2_ref, w2_ref,
                              *rest, stride, H, W, Cin, Cout, H_out, W_out, has_shortcut):
    if has_shortcut:
        ws_ref, o_ref, a1p_ref, a2p_ref = rest
    else:
        o_ref, a1p_ref, a2p_ref = rest

    # --- BN1 + ReLU, staged into a zero-padded VMEM scratch (halo handled in-kernel) ---
    a1p_ref[...] = jnp.zeros_like(a1p_ref)
    act1 = jnp.maximum(x_ref[...].astype(jnp.float32) * s1_ref[...] + b1_ref[...], 0.0)
    a1p_ref[pl.ds(1, H), pl.ds(1, W), :] = act1

    # --- conv1: 3x3, stride, as a single K = 9*Cin MXU contraction ---
    p1 = _im2col(a1p_ref, 3, 3, stride, H_out, W_out, Cin)                 # (HW, 9*Cin)
    out1 = jnp.dot(p1, w1_ref[...], preferred_element_type=jnp.float32)    # (HW, Cout)

    # --- BN2 + ReLU, staged into the second padded scratch ---
    a2p_ref[...] = jnp.zeros_like(a2p_ref)
    act2 = jnp.maximum(out1.reshape(H_out, W_out, Cout) * s2_ref[...] + b2_ref[...], 0.0)
    a2p_ref[pl.ds(1, H_out), pl.ds(1, W_out), :] = act2

    # --- shortcut branch: identity or strided 1x1 conv on act1 (reused from VMEM) ---
    if has_shortcut:
        a1s = a1p_ref[_ds(1, H_out, stride), _ds(1, W_out, stride), :]     # act1[::stride]
        res = jnp.dot(a1s.reshape(H_out * W_out, Cin), ws_ref[...],
                      preferred_element_type=jnp.float32).reshape(H_out, W_out, Cout)
    else:
        res = x_ref[...].astype(jnp.float32)

    # --- conv2: 3x3, stride 1, K = 9*Cout contraction, + residual add, single store ---
    p2 = _im2col(a2p_ref, 3, 3, 1, H_out, W_out, Cout)                     # (HW, 9*Cout)
    out2 = jnp.dot(p2, w2_ref[...], preferred_element_type=jnp.float32)
    o_ref[...] = (out2.reshape(H_out, W_out, Cout) + res).astype(o_ref.dtype)


def basic_block(x, p, stride):
    """One fused WRN BasicBlock forward (NHWC) -> a single pallas_call per block."""
    N, H, W, Cin = x.shape
    Cout = p["conv1_w"].shape[-1]
    H_out = (H + 2 - 3) // stride + 1
    W_out = (W + 2 - 3) // stride + 1
    has_shortcut = "shortcut_w" in p

    # Host-side reshapes (tiny, done once): fold (ky, kx, ci) into one contraction dim so the
    # in-kernel matmul needs no weight relayout; BN params become broadcastable (1,1,C).
    s1 = p["bn1_scale"].reshape(1, 1, Cin)
    b1 = p["bn1_bias"].reshape(1, 1, Cin)
    s2 = p["bn2_scale"].reshape(1, 1, Cout)
    b2 = p["bn2_bias"].reshape(1, 1, Cout)
    w1 = p["conv1_w"].reshape(9 * Cin, Cout)   # row-major (ky,kx,ci) matches _im2col order
    w2 = p["conv2_w"].reshape(9 * Cout, Cout)

    in_specs = [
        pl.BlockSpec((None, H, W, Cin), lambda n: (n, 0, 0, 0)),
        pl.BlockSpec((1, 1, Cin), lambda n: (0, 0, 0)),
        pl.BlockSpec((1, 1, Cin), lambda n: (0, 0, 0)),
        pl.BlockSpec((9 * Cin, Cout), lambda n: (0, 0)),
        pl.BlockSpec((1, 1, Cout), lambda n: (0, 0, 0)),
        pl.BlockSpec((1, 1, Cout), lambda n: (0, 0, 0)),
        pl.BlockSpec((9 * Cout, Cout), lambda n: (0, 0)),
    ]
    args = [x, s1, b1, w1, s2, b2, w2]
    flops = 2 * N * H_out * W_out * (9 * Cin * Cout + 9 * Cout * Cout)
    if has_shortcut:
        ws = p["shortcut_w"].reshape(Cin, Cout)
        in_specs.append(pl.BlockSpec((Cin, Cout), lambda n: (0, 0)))
        args.append(ws)
        flops += 2 * N * H_out * W_out * Cin * Cout

    itemsize = 4  # f32
    bytes_accessed = itemsize * (
        x.size + s1.size + b1.size + w1.size + s2.size + b2.size + w2.size
        + (Cin * Cout if has_shortcut else 0)
        + N * H_out * W_out * Cout
    )

    kernel = functools.partial(
        _fused_basic_block_kernel,
        stride=stride, H=H, W=W, Cin=Cin, Cout=Cout,
        H_out=H_out, W_out=W_out, has_shortcut=has_shortcut,
    )

    return pl.pallas_call(
        kernel,
        out_shape=jax.ShapeDtypeStruct((N, H_out, W_out, Cout), x.dtype),
        grid=(N,),
        in_specs=in_specs,
        out_specs=pl.BlockSpec((None, H_out, W_out, Cout), lambda n: (n, 0, 0, 0)),
        scratch_shapes=[
            pltpu.VMEM((H + 2, W + 2, Cin), jnp.float32),        # padded act1
            pltpu.VMEM((H_out + 2, W_out + 2, Cout), jnp.float32),  # padded act2
        ],
        compiler_params=pltpu.CompilerParams(dimension_semantics=("parallel",)),
        cost_estimate=pl.CostEstimate(
            flops=flops, transcendentals=0, bytes_accessed=bytes_accessed),
    )(*args)


# ---------------------------------------------------------------------------
# NetworkBlock (stack of WRN BasicBlocks)
# ---------------------------------------------------------------------------
def network_block_forward(x_nchw, params, stride):
    """x_nchw: (N, C, H, W) like PyTorch.  Returns (N, C_out, H_out, W_out)."""
    x = jnp.transpose(x_nchw, (0, 2, 3, 1))  # NCHW -> NHWC
    for i, p in enumerate(params):
        x = basic_block(x, p, stride if i == 0 else 1)
    return jnp.transpose(x, (0, 3, 1, 2))  # NHWC -> NCHW


# ---------------------------------------------------------------------------
# Deterministic parameter construction
# ---------------------------------------------------------------------------
def _bn_params(key, c, eps=1e-5):
    k1, k2, k3, k4 = jax.random.split(key, 4)
    gamma = 1.0 + 0.1 * jax.random.normal(k1, (c,), jnp.float32)
    beta = 0.1 * jax.random.normal(k2, (c,), jnp.float32)
    mean = 0.1 * jax.random.normal(k3, (c,), jnp.float32)
    var = jax.random.uniform(k4, (c,), jnp.float32, 0.5, 1.5)
    scale = gamma * jax.lax.rsqrt(var + eps)
    bias = beta - mean * scale
    return scale, bias


def _conv_w(key, kh, kw, cin, cout):
    std = math.sqrt(2.0 / (kh * kw * cout))  # WRN kaiming init
    return std * jax.random.normal(key, (kh, kw, cin, cout), jnp.float32)


def init_basic_block_params(key, in_planes, out_planes):
    ks = jax.random.split(key, 5)
    s1, b1 = _bn_params(ks[0], in_planes)
    s2, b2 = _bn_params(ks[1], out_planes)
    p = dict(
        bn1_scale=s1, bn1_bias=b1,
        conv1_w=_conv_w(ks[2], 3, 3, in_planes, out_planes),
        bn2_scale=s2, bn2_bias=b2,
        conv2_w=_conv_w(ks[3], 3, 3, out_planes, out_planes),
    )
    if in_planes != out_planes:
        p["shortcut_w"] = _conv_w(ks[4], 1, 1, in_planes, out_planes)
    return p


def init_network_block_params(key, nb_layers, in_planes, out_planes):
    keys = jax.random.split(key, nb_layers)
    params = []
    for i in range(nb_layers):
        cin = in_planes if i == 0 else out_planes
        params.append(init_basic_block_params(keys[i], cin, out_planes))
    return params


# ---------------------------------------------------------------------------
# Pure-JAX reference (for correctness check)
# ---------------------------------------------------------------------------
def _ref_conv(x, w, stride, padding):
    return jax.lax.conv_general_dilated(
        x, w, (stride, stride), [(padding, padding)] * 2,
        dimension_numbers=("NHWC", "HWIO", "NHWC"),
    )


def _ref_basic_block(x, p, stride):
    act1 = jnp.maximum(x * p["bn1_scale"] + p["bn1_bias"], 0.0)
    out = _ref_conv(act1, p["conv1_w"], stride, 1)
    act2 = jnp.maximum(out * p["bn2_scale"] + p["bn2_bias"], 0.0)
    out = _ref_conv(act2, p["conv2_w"], 1, 1)
    res = x if "shortcut_w" not in p else _ref_conv(act1, p["shortcut_w"], stride, 0)
    return res + out


def _ref_forward(x_nchw, params, stride):
    x = jnp.transpose(x_nchw, (0, 2, 3, 1))
    for i, p in enumerate(params):
        x = _ref_basic_block(x, p, stride if i == 0 else 1)
    return jnp.transpose(x, (0, 3, 1, 2))


# ---------------------------------------------------------------------------
if __name__ == "__main__":
    key = jax.random.PRNGKey(0)
    k_x, k_p = jax.random.split(key)

    # Small shapes consistent with the module: NetworkBlock(nb_layers=2, 4->8, stride=2)
    N, C_in, H, W = 2, 4, 16, 16
    nb_layers, out_planes, stride = 2, 8, 2

    x = jax.random.normal(k_x, (N, C_in, H, W), jnp.float32)  # NCHW like PyTorch
    params = init_network_block_params(k_p, nb_layers, C_in, out_planes)

    y = network_block_forward(x, params, stride)
    y = jax.block_until_ready(y)

    y_ref = _ref_forward(x, params, stride)
    assert y.shape == (N, out_planes, H // stride, W // stride), y.shape
    assert jnp.allclose(y, y_ref, rtol=1e-4, atol=1e-4), float(jnp.max(jnp.abs(y - y_ref)))

    print("KERNEL_OK")
</pallas_src>

<mosaic_0001>
module attributes {stable_mosaic.version = 11 : i64} {
  func.func @_fused_basic_block_kernel(%arg0: i32, %arg1: memref<1x16x16x4xf32, #tpu.memory_space<vmem>>, %arg2: memref<1x1x4xf32, #tpu.memory_space<vmem>>, %arg3: memref<1x1x4xf32, #tpu.memory_space<vmem>>, %arg4: memref<36x8xf32, #tpu.memory_space<vmem>>, %arg5: memref<1x1x8xf32, #tpu.memory_space<vmem>>, %arg6: memref<1x1x8xf32, #tpu.memory_space<vmem>>, %arg7: memref<72x8xf32, #tpu.memory_space<vmem>>, %arg8: memref<4x8xf32, #tpu.memory_space<vmem>>, %arg9: memref<1x8x8x8xf32, #tpu.memory_space<vmem>>, %arg10: memref<18x18x4xf32, #tpu.memory_space<vmem>>, %arg11: memref<10x10x8xf32, #tpu.memory_space<vmem>>) attributes {dimension_semantics = [#tpu.dimension_semantics<parallel>], iteration_bounds = array<i64: 2>, scalar_prefetch = 0 : i64, scratch_operands = 2 : i64, tpu.core_type = #tpu.core_type<tc>, window_params = [{transform_indices = @transform_0, window_bounds = array<i64: 1, 16, 16, 4>}, {pipeline_mode = #tpu.pipeline_mode<synchronous>, transform_indices = @transform_1, window_bounds = array<i64: 1, 1, 4>}, {pipeline_mode = #tpu.pipeline_mode<synchronous>, transform_indices = @transform_2, window_bounds = array<i64: 1, 1, 4>}, {pipeline_mode = #tpu.pipeline_mode<synchronous>, transform_indices = @transform_3, window_bounds = array<i64: 36, 8>}, {pipeline_mode = #tpu.pipeline_mode<synchronous>, transform_indices = @transform_4, window_bounds = array<i64: 1, 1, 8>}, {pipeline_mode = #tpu.pipeline_mode<synchronous>, transform_indices = @transform_5, window_bounds = array<i64: 1, 1, 8>}, {pipeline_mode = #tpu.pipeline_mode<synchronous>, transform_indices = @transform_6, window_bounds = array<i64: 72, 8>}, {pipeline_mode = #tpu.pipeline_mode<synchronous>, transform_indices = @transform_7, window_bounds = array<i64: 4, 8>}, {transform_indices = @transform_8, window_bounds = array<i64: 1, 8, 8, 8>}]} {
    %cst = arith.constant 0.000000e+00 : f32
    %0 = vector.broadcast %cst : f32 to vector<18x18x4xf32>
    %c0 = arith.constant 0 : index
    %c0_0 = arith.constant 0 : index
    %c0_1 = arith.constant 0 : index
    %1 = vector.load %arg10[%c0, %c0_0, %c0_1] : memref<18x18x4xf32, #tpu.memory_space<vmem>>, vector<18x18x4xf32>
    tpu.vector_store %arg10[%c0, %c0_0, %c0_1], %0 {strides = array<i32>} : memref<18x18x4xf32, #tpu.memory_space<vmem>>, vector<18x18x4xf32>,
    %c0_2 = arith.constant 0 : index
    %c0_3 = arith.constant 0 : index
    %c0_4 = arith.constant 0 : index
    %c0_5 = arith.constant 0 : index
    %2 = vector.load %arg1[%c0_2, %c0_3, %c0_4, %c0_5] : memref<1x16x16x4xf32, #tpu.memory_space<vmem>>, vector<1x16x16x4xf32>
    %3 = vector.shape_cast %2 : vector<1x16x16x4xf32> to vector<16x16x4xf32>
    %c0_6 = arith.constant 0 : index
    %c0_7 = arith.constant 0 : index
    %c0_8 = arith.constant 0 : index
    %4 = vector.load %arg2[%c0_6, %c0_7, %c0_8] : memref<1x1x4xf32, #tpu.memory_space<vmem>>, vector<1x1x4xf32>
    %5 = vector.broadcast %4 : vector<1x1x4xf32> to vector<16x16x4xf32>
    %6 = arith.mulf %3, %5 : vector<16x16x4xf32>
    %c0_9 = arith.constant 0 : index
    %c0_10 = arith.constant 0 : index
    %c0_11 = arith.constant 0 : index
    %7 = vector.load %arg3[%c0_9, %c0_10, %c0_11] : memref<1x1x4xf32, #tpu.memory_space<vmem>>, vector<1x1x4xf32>
    %8 = vector.broadcast %7 : vector<1x1x4xf32> to vector<16x16x4xf32>
    %9 = arith.addf %6, %8 : vector<16x16x4xf32>
    %cst_12 = arith.constant 0.000000e+00 : f32
    %10 = vector.broadcast %cst_12 : f32 to vector<16x16x4xf32>
    %11 = arith.maximumf %9, %10 : vector<16x16x4xf32>
    %c1 = arith.constant 1 : index
    %c1_13 = arith.constant 1 : index
    %c0_14 = arith.constant 0 : index
    %12 = vector.load %arg10[%c1, %c1_13, %c0_14] : memref<18x18x4xf32, #tpu.memory_space<vmem>>, vector<16x16x4xf32>
    tpu.vector_store %arg10[%c1, %c1_13, %c0_14], %11 {strides = array<i32>} : memref<18x18x4xf32, #tpu.memory_space<vmem>>, vector<16x16x4xf32>,
    %c0_15 = arith.constant 0 : index
    %c0_16 = arith.constant 0 : index
    %c0_17 = arith.constant 0 : index
    %13 = tpu.strided_load %arg10[%c0_15, %c0_16, %c0_17] {strides = array<i32: 2, 2, 1>} : memref<18x18x4xf32, #tpu.memory_space<vmem>>, vector<8x8x4xf32>
    %14 = vector.shape_cast %13 : vector<8x8x4xf32> to vector<64x4xf32>
    %c0_18 = arith.constant 0 : index
    %c1_19 = arith.constant 1 : index
    %c0_20 = arith.constant 0 : index
    %15 = tpu.strided_load %arg10[%c0_18, %c1_19, %c0_20] {strides = array<i32: 2, 2, 1>} : memref<18x18x4xf32, #tpu.memory_space<vmem>>, vector<8x8x4xf32>
    %16 = vector.shape_cast %15 : vector<8x8x4xf32> to vector<64x4xf32>
    %c0_21 = arith.constant 0 : index
    %c2 = arith.constant 2 : index
    %c0_22 = arith.constant 0 : index
    %17 = tpu.strided_load %arg10[%c0_21, %c2, %c0_22] {strides = array<i32: 2, 2, 1>} : memref<18x18x4xf32, #tpu.memory_space<vmem>>, vector<8x8x4xf32>
    %18 = vector.shape_cast %17 : vector<8x8x4xf32> to vector<64x4xf32>
    %c1_23 = arith.constant 1 : index
    %c0_24 = arith.constant 0 : index
    %c0_25 = arith.constant 0 : index
    %19 = tpu.strided_load %arg10[%c1_23, %c0_24, %c0_25] {strides = array<i32: 2, 2, 1>} : memref<18x18x4xf32, #tpu.memory_space<vmem>>, vector<8x8x4xf32>
    %20 = vector.shape_cast %19 : vector<8x8x4xf32> to vector<64x4xf32>
    %c1_26 = arith.constant 1 : index
    %c1_27 = arith.constant 1 : index
    %c0_28 = arith.constant 0 : index
    %21 = tpu.strided_load %arg10[%c1_26, %c1_27, %c0_28] {strides = array<i32: 2, 2, 1>} : memref<18x18x4xf32, #tpu.memory_space<vmem>>, vector<8x8x4xf32>
    %22 = vector.shape_cast %21 : vector<8x8x4xf32> to vector<64x4xf32>
    %c1_29 = arith.constant 1 : index
    %c2_30 = arith.constant 2 : index
    %c0_31 = arith.constant 0 : index
    %23 = tpu.strided_load %arg10[%c1_29, %c2_30, %c0_31] {strides = array<i32: 2, 2, 1>} : memref<18x18x4xf32, #tpu.memory_space<vmem>>, vector<8x8x4xf32>
    %24 = vector.shape_cast %23 : vector<8x8x4xf32> to vector<64x4xf32>
    %c2_32 = arith.constant 2 : index
    %c0_33 = arith.constant 0 : index
    %c0_34 = arith.constant 0 : index
    %25 = tpu.strided_load %arg10[%c2_32, %c0_33, %c0_34] {strides = array<i32: 2, 2, 1>} : memref<18x18x4xf32, #tpu.memory_space<vmem>>, vector<8x8x4xf32>
    %26 = vector.shape_cast %25 : vector<8x8x4xf32> to vector<64x4xf32>
    %c2_35 = arith.constant 2 : index
    %c1_36 = arith.constant 1 : index
    %c0_37 = arith.constant 0 : index
    %27 = tpu.strided_load %arg10[%c2_35, %c1_36, %c0_37] {strides = array<i32: 2, 2, 1>} : memref<18x18x4xf32, #tpu.memory_space<vmem>>, vector<8x8x4xf32>
    %28 = vector.shape_cast %27 : vector<8x8x4xf32> to vector<64x4xf32>
    %c2_38 = arith.constant 2 : index
    %c2_39 = arith.constant 2 : index
    %c0_40 = arith.constant 0 : index
    %29 = tpu.strided_load %arg10[%c2_38, %c2_39, %c0_40] {strides = array<i32: 2, 2, 1>} : memref<18x18x4xf32, #tpu.memory_space<vmem>>, vector<8x8x4xf32>
    %30 = vector.shape_cast %29 : vector<8x8x4xf32> to vector<64x4xf32>
    %31 = tpu.concatenate %14, %16, %18, %20, %22, %24, %26, %28, %30 in 1 : vector<64x4xf32>, vector<64x4xf32>, vector<64x4xf32>, vector<64x4xf32>, vector<64x4xf32>, vector<64x4xf32>, vector<64x4xf32>, vector<64x4xf32>, vector<64x4xf32> -> vector<64x36xf32>
    %c0_41 = arith.constant 0 : index
    %c0_42 = arith.constant 0 : index
    %32 = vector.load %arg4[%c0_41, %c0_42] : memref<36x8xf32, #tpu.memory_space<vmem>>, vector<36x8xf32>
    %cst_43 = arith.constant dense<0.000000e+00> : vector<64x8xf32>
    %33 = tpu.matmul %31, %32, %cst_43 {dimension_numbers = #tpu.dot_dimension_numbers<[1], [0], [0], [1], [0, 0, 1, 1], [], []>} : vector<64x36xf32>, vector<36x8xf32>, vector<64x8xf32> -> vector<64x8xf32>
    %cst_44 = arith.constant 0.000000e+00 : f32
    %34 = vector.broadcast %cst_44 : f32 to vector<10x10x8xf32>
    %c0_45 = arith.constant 0 : index
    %c0_46 = arith.constant 0 : index
    %c0_47 = arith.constant 0 : index
    %35 = vector.load %arg11[%c0_45, %c0_46, %c0_47] : memref<10x10x8xf32, #tpu.memory_space<vmem>>, vector<10x10x8xf32>
    tpu.vector_store %arg11[%c0_45, %c0_46, %c0_47], %34 {strides = array<i32>} : memref<10x10x8xf32, #tpu.memory_space<vmem>>, vector<10x10x8xf32>,
    %36 = vector.shape_cast %33 : vector<64x8xf32> to vector<8x8x8xf32>
    %c0_48 = arith.constant 0 : index
    %c0_49 = arith.constant 0 : index
    %c0_50 = arith.constant 0 : index
    %37 = vector.load %arg5[%c0_48, %c0_49, %c0_50] : memref<1x1x8xf32, #tpu.memory_space<vmem>>, vector<1x1x8xf32>
    %38 = vector.broadcast %37 : vector<1x1x8xf32> to vector<8x8x8xf32>
    %39 = arith.mulf %36, %38 : vector<8x8x8xf32>
    %c0_51 = arith.constant 0 : index
    %c0_52 = arith.constant 0 : index
    %c0_53 = arith.constant 0 : index
    %40 = vector.load %arg6[%c0_51, %c0_52, %c0_53] : memref<1x1x8xf32, #tpu.memory_space<vmem>>, vector<1x1x8xf32>
    %41 = vector.broadcast %40 : vector<1x1x8xf32> to vector<8x8x8xf32>
    %42 = arith.addf %39, %41 : vector<8x8x8xf32>
    %cst_54 = arith.constant 0.000000e+00 : f32
    %43 = vector.broadcast %cst_54 : f32 to vector<8x8x8xf32>
    %44 = arith.maximumf %42, %43 : vector<8x8x8xf32>
    %c1_55 = arith.constant 1 : index
    %c1_56 = arith.constant 1 : index
    %c0_57 = arith.constant 0 : index
    %45 = vector.load %arg11[%c1_55, %c1_56, %c0_57] : memref<10x10x8xf32, #tpu.memory_space<vmem>>, vector<8x8x8xf32>
    tpu.vector_store %arg11[%c1_55, %c1_56, %c0_57], %44 {strides = array<i32>} : memref<10x10x8xf32, #tpu.memory_space<vmem>>, vector<8x8x8xf32>,
    %c1_58 = arith.constant 1 : index
    %c1_59 = arith.constant 1 : index
    %c0_60 = arith.constant 0 : index
    %46 = tpu.strided_load %arg10[%c1_58, %c1_59, %c0_60] {strides = array<i32: 2, 2, 1>} : memref<18x18x4xf32, #tpu.memory_space<vmem>>, vector<8x8x4xf32>
    %47 = vector.shape_cast %46 : vector<8x8x4xf32> to vector<64x4xf32>
    %c0_61 = arith.constant 0 : index
    %c0_62 = arith.constant 0 : index
    %48 = vector.load %arg8[%c0_61, %c0_62] : memref<4x8xf32, #tpu.memory_space<vmem>>, vector<4x8xf32>
    %cst_63 = arith.constant dense<0.000000e+00> : vector<64x8xf32>
    %49 = tpu.matmul %47, %48, %cst_63 {dimension_numbers = #tpu.dot_dimension_numbers<[1], [0], [0], [1], [0, 0, 1, 1], [], []>} : vector<64x4xf32>, vector<4x8xf32>, vector<64x8xf32> -> vector<64x8xf32>
    %50 = vector.shape_cast %49 : vector<64x8xf32> to vector<8x8x8xf32>
    %c0_64 = arith.constant 0 : index
    %c0_65 = arith.constant 0 : index
    %c0_66 = arith.constant 0 : index
    %51 = vector.load %arg11[%c0_64, %c0_65, %c0_66] : memref<10x10x8xf32, #tpu.memory_space<vmem>>, vector<8x8x8xf32>
    %52 = vector.shape_cast %51 : vector<8x8x8xf32> to vector<64x8xf32>
    %c0_67 = arith.constant 0 : index
    %c1_68 = arith.constant 1 : index
    %c0_69 = arith.constant 0 : index
    %53 = vector.load %arg11[%c0_67, %c1_68, %c0_69] : memref<10x10x8xf32, #tpu.memory_space<vmem>>, vector<8x8x8xf32>
    %54 = vector.shape_cast %53 : vector<8x8x8xf32> to vector<64x8xf32>
    %c0_70 = arith.constant 0 : index
    %c2_71 = arith.constant 2 : index
    %c0_72 = arith.constant 0 : index
    %55 = vector.load %arg11[%c0_70, %c2_71, %c0_72] : memref<10x10x8xf32, #tpu.memory_space<vmem>>, vector<8x8x8xf32>
    %56 = vector.shape_cast %55 : vector<8x8x8xf32> to vector<64x8xf32>
    %c1_73 = arith.constant 1 : index
    %c0_74 = arith.constant 0 : index
    %c0_75 = arith.constant 0 : index
    %57 = vector.load %arg11[%c1_73, %c0_74, %c0_75] : memref<10x10x8xf32, #tpu.memory_space<vmem>>, vector<8x8x8xf32>
    %58 = vector.shape_cast %57 : vector<8x8x8xf32> to vector<64x8xf32>
    %c1_76 = arith.constant 1 : index
    %c1_77 = arith.constant 1 : index
    %c0_78 = arith.constant 0 : index
    %59 = vector.load %arg11[%c1_76, %c1_77, %c0_78] : memref<10x10x8xf32, #tpu.memory_space<vmem>>, vector<8x8x8xf32>
    %60 = vector.shape_cast %59 : vector<8x8x8xf32> to vector<64x8xf32>
    %c1_79 = arith.constant 1 : index
    %c2_80 = arith.constant 2 : index
    %c0_81 = arith.constant 0 : index
    %61 = vector.load %arg11[%c1_79, %c2_80, %c0_81] : memref<10x10x8xf32, #tpu.memory_space<vmem>>, vector<8x8x8xf32>
    %62 = vector.shape_cast %61 : vector<8x8x8xf32> to vector<64x8xf32>
    %c2_82 = arith.constant 2 : index
    %c0_83 = arith.constant 0 : index
    %c0_84 = arith.constant 0 : index
    %63 = vector.load %arg11[%c2_82, %c0_83, %c0_84] : memref<10x10x8xf32, #tpu.memory_space<vmem>>, vector<8x8x8xf32>
    %64 = vector.shape_cast %63 : vector<8x8x8xf32> to vector<64x8xf32>
    %c2_85 = arith.constant 2 : index
    %c1_86 = arith.constant 1 : index
    %c0_87 = arith.constant 0 : index
    %65 = vector.load %arg11[%c2_85, %c1_86, %c0_87] : memref<10x10x8xf32, #tpu.memory_space<vmem>>, vector<8x8x8xf32>
    %66 = vector.shape_cast %65 : vector<8x8x8xf32> to vector<64x8xf32>
    %c2_88 = arith.constant 2 : index
    %c2_89 = arith.constant 2 : index
    %c0_90 = arith.constant 0 : index
    %67 = vector.load %arg11[%c2_88, %c2_89, %c0_90] : memref<10x10x8xf32, #tpu.memory_space<vmem>>, vector<8x8x8xf32>
    %68 = vector.shape_cast %67 : vector<8x8x8xf32> to vector<64x8xf32>
    %69 = tpu.concatenate %52, %54, %56, %58, %60, %62, %64, %66, %68 in 1 : vector<64x8xf32>, vector<64x8xf32>, vector<64x8xf32>, vector<64x8xf32>, vector<64x8xf32>, vector<64x8xf32>, vector<64x8xf32>, vector<64x8xf32>, vector<64x8xf32> -> vector<64x72xf32>
    %c0_91 = arith.constant 0 : index
    %c0_92 = arith.constant 0 : index
    %70 = vector.load %arg7[%c0_91, %c0_92] : memref<72x8xf32, #tpu.memory_space<vmem>>, vector<72x8xf32>
    %cst_93 = arith.constant dense<0.000000e+00> : vector<64x8xf32>
    %71 = tpu.matmul %69, %70, %cst_93 {dimension_numbers = #tpu.dot_dimension_numbers<[1], [0], [0], [1], [0, 0, 1, 1], [], []>} : vector<64x72xf32>, vector<72x8xf32>, vector<64x8xf32> -> vector<64x8xf32>
    %72 = vector.shape_cast %71 : vector<64x8xf32> to vector<8x8x8xf32>
    %73 = arith.addf %72, %50 : vector<8x8x8xf32>
    %c0_94 = arith.constant 0 : index
    %c0_95 = arith.constant 0 : index
    %c0_96 = arith.constant 0 : index
    %c0_97 = arith.constant 0 : index
    %74 = vector.load %arg9[%c0_94, %c0_95, %c0_96, %c0_97] : memref<1x8x8x8xf32, #tpu.memory_space<vmem>>, vector<1x8x8x8xf32>
    %75 = vector.shape_cast %74 : vector<1x8x8x8xf32> to vector<8x8x8xf32>
    %76 = vector.shape_cast %73 : vector<8x8x8xf32> to vector<1x8x8x8xf32>
    tpu.vector_store %arg9[%c0_94, %c0_95, %c0_96, %c0_97], %76 {strides = array<i32>} : memref<1x8x8x8xf32, #tpu.memory_space<vmem>>, vector<1x8x8x8xf32>,
    return
  }
  func.func @transform_0(%arg0: i32) -> (i32, i32, i32, i32) {
    %c0_i32 = arith.constant 0 : i32
    %c0_i32_0 = arith.constant 0 : i32
    %c0_i32_1 = arith.constant 0 : i32
    %c0_i32_2 = arith.constant 0 : i32
    return %arg0, %c0_i32, %c0_i32_0, %c0_i32_1 : i32, i32, i32, i32
  }
  func.func @transform_1(%arg0: i32) -> (i32, i32, i32) {
    %c0_i32 = arith.constant 0 : i32
    %c0_i32_0 = arith.constant 0 : i32
    %c0_i32_1 = arith.constant 0 : i32
    %c0_i32_2 = arith.constant 0 : i32
    return %c0_i32, %c0_i32_0, %c0_i32_1 : i32, i32, i32
  }
  func.func @transform_2(%arg0: i32) -> (i32, i32, i32) {
    %c0_i32 = arith.constant 0 : i32
    %c0_i32_0 = arith.constant 0 : i32
    %c0_i32_1 = arith.constant 0 : i32
    %c0_i32_2 = arith.constant 0 : i32
    return %c0_i32, %c0_i32_0, %c0_i32_1 : i32, i32, i32
  }
  func.func @transform_3(%arg0: i32) -> (i32, i32) {
    %c0_i32 = arith.constant 0 : i32
    %c0_i32_0 = arith.constant 0 : i32
    %c0_i32_1 = arith.constant 0 : i32
    return %c0_i32, %c0_i32_0 : i32, i32
  }
  func.func @transform_4(%arg0: i32) -> (i32, i32, i32) {
    %c0_i32 = arith.constant 0 : i32
    %c0_i32_0 = arith.constant 0 : i32
    %c0_i32_1 = arith.constant 0 : i32
    %c0_i32_2 = arith.constant 0 : i32
    return %c0_i32, %c0_i32_0, %c0_i32_1 : i32, i32, i32
  }
  func.func @transform_5(%arg0: i32) -> (i32, i32, i32) {
    %c0_i32 = arith.constant 0 : i32
    %c0_i32_0 = arith.constant 0 : i32
    %c0_i32_1 = arith.constant 0 : i32
    %c0_i32_2 = arith.constant 0 : i32
    return %c0_i32, %c0_i32_0, %c0_i32_1 : i32, i32, i32
  }
  func.func @transform_6(%arg0: i32) -> (i32, i32) {
    %c0_i32 = arith.constant 0 : i32
    %c0_i32_0 = arith.constant 0 : i32
    %c0_i32_1 = arith.constant 0 : i32
    return %c0_i32, %c0_i32_0 : i32, i32
  }
  func.func @transform_7(%arg0: i32) -> (i32, i32) {
    %c0_i32 = arith.constant 0 : i32
    %c0_i32_0 = arith.constant 0 : i32
    %c0_i32_1 = arith.constant 0 : i32
    return %c0_i32, %c0_i32_0 : i32, i32
  }
  func.func @transform_8(%arg0: i32) -> (i32, i32, i32, i32) {
    %c0_i32 = arith.constant 0 : i32
    %c0_i32_0 = arith.constant 0 : i32
    %c0_i32_1 = arith.constant 0 : i32
    %c0_i32_2 = arith.constant 0 : i32
    return %arg0, %c0_i32, %c0_i32_0, %c0_i32_1 : i32, i32, i32, i32
  }
}

</mosaic_0001>

<bundles_post_ra>
// kernel: tpu_custom_call.1
= control target key start
LH: loop header
LB: loop body
LE: loop exit
PB: predicated region body
PF: predicated region fallthrough
CT: control target
= control target key end

     0   :  { %13 = vsyncpa [#allocation5], 0  ;;  %s3178_s0 = inlined_call_operand.vmem [shape: f32[2,16,16,4], index: 0, kind: input, shape index: {}]   ;;  %s3179_s1 = inlined_call_operand.vmem [shape: f32[1,1,4], index: 1, kind: input, shape index: {}]   ;;  %s3180_s2 = inlined_call_operand.vmem [shape: f32[1,1,4], index: 2, kind: input, shape index: {}]   ;;  %s3181_s3 = inlined_call_operand.vmem [shape: f32[36,8], index: 3, kind: input, shape index: {}]   ;;  %s3182_s4 = inlined_call_operand.vmem [shape: f32[1,1,8], index: 4, kind: input, shape index: {}]   ;;  %s3183_s5 = inlined_call_operand.vmem [shape: f32[1,1,8], index: 5, kind: input, shape index: {}]   ;;  %s3184_s6 = inlined_call_operand.vmem [shape: f32[72,8], index: 6, kind: input, shape index: {}]   ;;  %s3185_s7 = inlined_call_operand.vmem [shape: f32[4,8], index: 7, kind: input, shape index: {}]   ;;  %s3186_s8 = inlined_call_operand.hbm [shape: f32[2,8,8,8], index: 8, kind: output, shape index: {}]  }
   0x1   :  { %15 = vsyncpa [#allocation5 + $0x1], 0  ;;  %s2368_s27 = smov 0   ;;  %s2370_s28 = smov 0  }
   0x2   :  { %s2372_s29 = smov 0   ;;  %s2374_s30 = smov 0  }
   0x3 LB: > { %s2389_s9 = sadd.s32 4294967295, %s2306_s30   ;;  %s2026_s10 = sadd.s32 4294967294, %s2306_s30   ;;  %s2306_s30 = sphi %s2374_s30, %s3195_s30   ;;  %s2302_s29 = sphi %s2372_s29, %s3194_s29   ;;  %s2298_s28 = sphi %s2370_s28, %s3193_s28   ;;  %s2294_s27 = sphi %s2368_s27, %s3192_s27  }
   0x4   : > { %s2393_s11 = sadd.s32 1, %s2306_s30   ;;  %s201_s12 = sadd.s32 1, %s2302_s29 }
   0x5   : > { %s198_s13 = ssub.s32 %s2306_s30, %s2393_s11  ;;  %p211_p0 = scmp.ne.s32.totalorder %s2302_s29, %s2298_s28 }
   0x6   : > { %p199_p1 = scmp.eq.s32.totalorder %s198_s13, 0  ;;  %p212_p2 = scmp.eq.s32.totalorder %s2389_s9, 1 }
   0x7   : > { %p217_p3 = scmp.ne.s32.totalorder %s2298_s28, %s2294_s27  ;;  %p218_p4 = scmp.eq.s32.totalorder %s2026_s10, 1 }
   0x8   : > { %s2404_s14 = scalar_select %p199_p1, %s2302_s29, %s201_s12  }
   0x9   : > { %p2406_p5 = por %p212_p2, %p211_p0  ;;  %p2410_p6 = por %p218_p4, %p217_p3 }
   0xa   : > { %p2029_p7 = scmp.ge.s32.totalorder %s2306_s30, 1  ;;  %p265_p8 = scmp.lt.s32.totalorder %s2306_s30, 3 }
   0xc   : > { %p266_p9 = pnand %p2029_p7, %p265_p8 }
   0xd   : > { %p299_p10 = scmp.lt.s32.totalorder (!%p266_p9), %s2389_s9, 1  ;;  %s2309_s26 = smov (!%p266_p9), 8  }
   0xe   : > { %269 = sbr.rel (%p266_p9) target bundleno = 889 (0x379), region = 52  ;;  %s2310_s10 = smov (!%p266_p9), 4  }
   0xf   : > { %s2311_s12 = smov (!%p266_p9), 12   ;;  %s3187_s13 = smov (!%p266_p9), 16  }
  0x10   : > { %s2316_s24 = smov (!%p266_p9), 32   ;;  %s2319_s20 = smov (!%p266_p9), 40  }
  0x11   : > { %s2320_s21 = smov (!%p266_p9), 64   ;;  %s3191_s22 = smov (!%p266_p9), 16  }
  0x13   : > { %vm304_vm0 = vcmask 31744   ;;  %vm307_vm1 = vcmask 25600   ;;  %v2308_v0 = vmov 0.0   ;;  %s300_s17 = scalar_select %p299_p10, %s2389_s9, 1  ;;  %v2523_v1 = vld [vmem:[%s3179_s1] ss:$0 sm:$0xff] }
  0x14   : > { %305 = vst.msk [vmem:[#allocation2] sm:$0xff] %vm304_vm0, %v2308_v0  ;;  %306 = vst.msk [vmem:[#allocation2 + $0x8] sm:$0xff] %vm304_vm0, %v2308_v0  ;;  %vm941_vm2 = vcmask 64512   ;;  %v2533_v2 = vld [vmem:[%s3180_s2] ss:$0 sm:$0xff]  ;;  %vm1034_vm3 = vcmask 1043456  }
  0x15   : > { %308 = vst.msk [vmem:[#allocation2 + $0x10] sm:$0x3] %vm307_vm1, %v2308_v0  ;;  %311 = vst.msk [vmem:[#allocation2 + $0x28] sm:$0x3] %vm307_vm1, %v2308_v0  ;;  %s2068_s18 = sshll.u32 %s300_s17, 8  ;;  %s2313_s17 = smov 20  }
  0x16   : > { %309 = vst.msk [vmem:[#allocation2 + $0x18] sm:$0xff] %vm304_vm0, %v2308_v0  ;;  %310 = vst.msk [vmem:[#allocation2 + $0x20] sm:$0xff] %vm304_vm0, %v2308_v0  ;;  %s2528_s23 = scalar_lea.vmem %s3178_s0, %s2068_s18  ;;  %s2314_s18 = smov 24   ;;  %vm950_vm4 = vcmask 97280   ;;  %vm959_vm5 = vcmask 130048   ;;  %vm968_vm6 = vcmask 162816  }
  0x17   : > { %312 = vst.msk [vmem:[#allocation2 + $0x30] sm:$0xff] %vm304_vm0, %v2308_v0  ;;  %313 = vst.msk [vmem:[#allocation2 + $0x38] sm:$0xff] %vm304_vm0, %v2308_v0  ;;  %v362_v3 = vld [vmem:[%s2528_s23 + $0x10] sm:$0xff]  ;;  %v363_v4 = vld [vmem:[%s2528_s23 + $0x18] sm:$0xff]  ;;  %vm977_vm7 = vcmask 195584   ;;  %vm986_vm8 = vcmask 228352  }
  0x18   : > { %314 = vst.msk [vmem:[#allocation2 + $0x40] sm:$0x3] %vm307_vm1, %v2308_v0  ;;  %317 = vst.msk [vmem:[#allocation2 + $0x58] sm:$0x3] %vm307_vm1, %v2308_v0  ;;  %v364_v5 = vld [vmem:[%s2528_s23 + $0x20] sm:$0xff]  ;;  %v401_v8 = vmul.f32 %v2523_v1, %v362_v3  ;;  %v402_v9 = vmul.f32 %v2523_v1, %v363_v4  ;;  %v365_v10 = vld [vmem:[%s2528_s23 + $0x28] sm:$0xff] }
  0x19   : > { %315 = vst.msk [vmem:[#allocation2 + $0x48] sm:$0xff] %vm304_vm0, %v2308_v0  ;;  %316 = vst.msk [vmem:[#allocation2 + $0x50] sm:$0xff] %vm304_vm0, %v2308_v0  ;;  %v403_v11 = vmul.f32 %v2523_v1, %v364_v5  ;;  %v404_v12 = vmul.f32 %v2523_v1, %v365_v10  ;;  %v360_v13 = vld [vmem:[%s2528_s23] sm:$0xff]  ;;  %v361_v14 = vld [vmem:[%s2528_s23 + $0x8] sm:$0xff]  ;;  %vm995_vm9 = vcmask 261120   ;;  %vm1009_vm10 = vcmask 293888  }
  0x1a   : > { %318 = vst.msk [vmem:[#allocation2 + $0x60] sm:$0xff] %vm304_vm0, %v2308_v0  ;;  %319 = vst.msk [vmem:[#allocation2 + $0x68] sm:$0xff] %vm304_vm0, %v2308_v0  ;;  %v440_v15 = vadd.f32 %v2533_v2, %v401_v8  ;;  %v441_v16 = vadd.f32 %v2533_v2, %v402_v9  ;;  %v399_v18 = vmul.f32 %v2523_v1, %v360_v13  ;;  %v366_v19 = vld [vmem:[%s2528_s23 + $0x30] sm:$0xff]  ;;  %v367_v20 = vld [vmem:[%s2528_s23 + $0x38] sm:$0xff]  ;;  %vm1144_vm11 = vcmask 58368  }
  0x1b   : > { %320 = vst.msk [vmem:[#allocation2 + $0x70] sm:$0x3] %vm307_vm1, %v2308_v0  ;;  %323 = vst.msk [vmem:[#allocation2 + $0x88] sm:$0x3] %vm307_vm1, %v2308_v0  ;;  %v551_v7 = vld [vmem:[#allocation2 + $0x1] ss:$2 sm:$0xff]  ;;  %v442_v17 = vadd.f32 %v2533_v2, %v403_v11  ;;  %v443_v21 = vadd.f32 %v2533_v2, %v404_v12  ;;  %v400_v22 = vmul.f32 %v2523_v1, %v361_v14 }
  0x1c   : > { %321 = vst.msk [vmem:[#allocation2 + $0x78] sm:$0xff] %vm304_vm0, %v2308_v0  ;;  %322 = vst.msk [vmem:[#allocation2 + $0x80] sm:$0xff] %vm304_vm0, %v2308_v0  ;;  %v567_v6 = vld [vmem:[#allocation2 + $0x2] ss:$2 sm:$0xff]  ;;  %685 = vrot.lane.b32.xlu0 %v551_v7, %s2310_s10  ;;  %v405_v23 = vmul.f32 %v2523_v1, %v366_v19  ;;  %v406_v24 = vmul.f32 %v2523_v1, %v367_v20  ;;  %v371_v26 = vld [vmem:[%s2528_s23 + $0x58] sm:$0xff]  ;;  %v472_v28 = vmax.f32 %v440_v15, 0.0 }
  0x1d   : > { %324 = vst.msk [vmem:[#allocation2 + $0x90] sm:$0xff] %vm304_vm0, %v2308_v0  ;;  %325 = vst.msk [vmem:[#allocation2 + $0x98] sm:$0xff] %vm304_vm0, %v2308_v0  ;;  %717 = vrot.lane.b32.xlu1 %v567_v6, %s2309_s26  ;;  %v370_v25 = vld [vmem:[%s2528_s23 + $0x50] sm:$0xff]  ;;  %v368_v27 = vld [vmem:[%s2528_s23 + $0x40] sm:$0xff]  ;;  %v473_v29 = vmax.f32 %v441_v16, 0.0  ;;  %v474_v30 = vmax.f32 %v442_v17, 0.0  ;;  %v438_v31 = vadd.f32 %v2533_v2, %v399_v18  ;;  %v439_v34 = vadd.f32 %v2533_v2, %v400_v22 }
  0x1e   : > { %326 = vst.msk [vmem:[#allocation2 + $0xa0] sm:$0x3] %vm307_vm1, %v2308_v0  ;;  %329 = vst.msk [vmem:[#allocation2 + $0xb8] sm:$0x3] %vm307_vm1, %v2308_v0  ;;  %v369_v32 = vld [vmem:[%s2528_s23 + $0x48] sm:$0xff]  ;;  %v475_v33 = vmax.f32 %v443_v21, 0.0  ;;  %v444_v35 = vadd.f32 %v2533_v2, %v405_v23  ;;  %v445_v36 = vadd.f32 %v2533_v2, %v406_v24  ;;  %v409_v39 = vmul.f32 %v2523_v1, %v370_v25 }
  0x1f   : > { %327 = vst.msk [vmem:[#allocation2 + $0xa8] sm:$0xff] %vm304_vm0, %v2308_v0  ;;  %328 = vst.msk [vmem:[#allocation2 + $0xb0] sm:$0xff] %vm304_vm0, %v2308_v0  ;;  %v372_v37 = vld [vmem:[%s2528_s23 + $0x60] sm:$0xff]  ;;  %v470_v38 = vmax.f32 %v438_v31, 0.0  ;;  %v410_v40 = vmul.f32 %v2523_v1, %v371_v26  ;;  %v407_v41 = vmul.f32 %v2523_v1, %v368_v27  ;;  %v373_v42 = vld [vmem:[%s2528_s23 + $0x68] sm:$0xff]  ;;  %v471_v45 = vmax.f32 %v439_v34, 0.0 }
  0x20   : > { %330 = vst.msk [vmem:[#allocation2 + $0xc0] sm:$0xff] %vm304_vm0, %v2308_v0  ;;  %331 = vst.msk [vmem:[#allocation2 + $0xc8] sm:$0xff] %vm304_vm0, %v2308_v0  ;;  %v374_v43 = vld [vmem:[%s2528_s23 + $0x70] sm:$0xff]  ;;  %v375_v44 = vld [vmem:[%s2528_s23 + $0x78] sm:$0xff]  ;;  %v476_v46 = vmax.f32 %v444_v35, 0.0  ;;  %v477_v47 = vmax.f32 %v445_v36, 0.0  ;;  %v408_v48 = vmul.f32 %v2523_v1, %v369_v32  ;;  %v448_v49 = vadd.f32 %v2533_v2, %v409_v39 }
  0x21   : > { %332 = vst.msk [vmem:[#allocation2 + $0xd0] sm:$0x3] %vm307_vm1, %v2308_v0  ;;  %335 = vst.msk [vmem:[#allocation2 + $0xe8] sm:$0x3] %vm307_vm1, %v2308_v0  ;;  %v449_v50 = vadd.f32 %v2533_v2, %v410_v40  ;;  %v446_v51 = vadd.f32 %v2533_v2, %v407_v41  ;;  %v411_v52 = vmul.f32 %v2523_v1, %v372_v37  ;;  %v378_v53 = vld [vmem:[%s2528_s23 + $0x90] sm:$0xff]  ;;  %v379_v58 = vld [vmem:[%s2528_s23 + $0x98] sm:$0xff] }
  0x22   : > { %333 = vst.msk [vmem:[#allocation2 + $0xd8] sm:$0xff] %vm304_vm0, %v2308_v0  ;;  %334 = vst.msk [vmem:[#allocation2 + $0xe0] sm:$0xff] %vm304_vm0, %v2308_v0  ;;  %v447_v54 = vadd.f32 %v2533_v2, %v408_v48  ;;  %v412_v55 = vmul.f32 %v2523_v1, %v373_v42  ;;  %v413_v56 = vmul.f32 %v2523_v1, %v374_v43  ;;  %v376_v59 = vld [vmem:[%s2528_s23 + $0x80] sm:$0xff]  ;;  %v377_v60 = vld [vmem:[%s2528_s23 + $0x88] sm:$0xff]  ;;  %v480_v61 = vmax.f32 %v448_v49, 0.0 }
  0x23   : > { %336 = vst.msk [vmem:[#allocation2 + $0xf0] sm:$0xff] %vm304_vm0, %v2308_v0  ;;  %337 = vst.msk [vmem:[#allocation2 + $0xf8] sm:$0xff] %vm304_vm0, %v2308_v0  ;;  %v414_v57 = vmul.f32 %v2523_v1, %v375_v44  ;;  %v481_v62 = vmax.f32 %v449_v50, 0.0  ;;  %v478_v63 = vmax.f32 %v446_v51, 0.0  ;;  %v450_v3 = vadd.f32 %v2533_v2, %v411_v52  ;;  %v380_v4 = vld [vmem:[%s2528_s23 + $0xa0] sm:$0xff]  ;;  %v381_v5 = vld [vmem:[%s2528_s23 + $0xa8] sm:$0xff] }
  0x24   : > { %338 = vst.msk [vmem:[#allocation2 + $0x100] sm:$0x3] %vm307_vm1, %v2308_v0  ;;  %341 = vst.msk [vmem:[#allocation2 + $0x118] sm:$0x3] %vm307_vm1, %v2308_v0  ;;  %v382_v6 = vld [vmem:[%s2528_s23 + $0xb0] sm:$0xff]  ;;  %v479_v7 = vmax.f32 %v447_v54, 0.0  ;;  %v451_v8 = vadd.f32 %v2533_v2, %v412_v55  ;;  %v452_v9 = vadd.f32 %v2533_v2, %v413_v56  ;;  %v417_v12 = vmul.f32 %v2523_v1, %v378_v53 }
  0x25   : > { %339 = vst.msk [vmem:[#allocation2 + $0x108] sm:$0xff] %vm304_vm0, %v2308_v0  ;;  %340 = vst.msk [vmem:[#allocation2 + $0x110] sm:$0xff] %vm304_vm0, %v2308_v0  ;;  %v453_v10 = vadd.f32 %v2533_v2, %v414_v57  ;;  %v482_v11 = vmax.f32 %v450_v3, 0.0  ;;  %v418_v13 = vmul.f32 %v2523_v1, %v379_v58  ;;  %v415_v14 = vmul.f32 %v2523_v1, %v376_v59  ;;  %v383_v15 = vld [vmem:[%s2528_s23 + $0xb8] sm:$0xff]  ;;  %v386_v16 = vld [vmem:[%s2528_s23 + $0xd0] sm:$0xff] }
  0x26   : > { %342 = vst.msk [vmem:[#allocation2 + $0x120] sm:$0xff] %vm304_vm0, %v2308_v0  ;;  %343 = vst.msk [vmem:[#allocation2 + $0x128] sm:$0xff] %vm304_vm0, %v2308_v0  ;;  %v387_v17 = vld [vmem:[%s2528_s23 + $0xd8] sm:$0xff]  ;;  %v416_v20 = vmul.f32 %v2523_v1, %v377_v60  ;;  %v419_v21 = vmul.f32 %v2523_v1, %v380_v4  ;;  %v420_v22 = vmul.f32 %v2523_v1, %v381_v5  ;;  %v384_v24 = vld [vmem:[%s2528_s23 + $0xc0] sm:$0xff]  ;;  %v483_v31 = vmax.f32 %v451_v8, 0.0 }
  0x27   : > { %344 = vst.msk [vmem:[#allocation2 + $0x130] sm:$0x3] %vm307_vm1, %v2308_v0  ;;  %347 = vst.msk [vmem:[#allocation2 + $0x148] sm:$0x3] %vm307_vm1, %v2308_v0  ;;  %v421_v23 = vmul.f32 %v2523_v1, %v382_v6  ;;  %v456_v25 = vadd.f32 %v2533_v2, %v417_v12  ;;  %v457_v26 = vadd.f32 %v2533_v2, %v418_v13  ;;  %v484_v32 = vmax.f32 %v452_v9, 0.0  ;;  %v389_v43 = vld [vmem:[%s2528_s23 + $0xe8] sm:$0xff] }
  0x28   : > { %345 = vst.msk [vmem:[#allocation2 + $0x138] sm:$0xff] %vm304_vm0, %v2308_v0  ;;  %346 = vst.msk [vmem:[#allocation2 + $0x140] sm:$0xff] %vm304_vm0, %v2308_v0  ;;  %v454_v27 = vadd.f32 %v2533_v2, %v415_v14  ;;  %v458_v34 = vadd.f32 %v2533_v2, %v419_v21  ;;  %v459_v36 = vadd.f32 %v2533_v2, %v420_v22  ;;  %v391_v50 = vld [vmem:[%s2528_s23 + $0xf8] sm:$0xff]  ;;  %vm1713_vm12 = vcmask 326656  }
  0x29   : > { %348 = vst.msk [vmem:[#allocation2 + $0x150] sm:$0xff] %vm304_vm0, %v2308_v0  ;;  %349 = vst.msk [vmem:[#allocation2 + $0x158] sm:$0xff] %vm304_vm0, %v2308_v0  ;;  %v422_v37 = vmul.f32 %v2523_v1, %v383_v15  ;;  %v425_v39 = vmul.f32 %v2523_v1, %v386_v16  ;;  %v426_v40 = vmul.f32 %v2523_v1, %v387_v17  ;;  %v489_v53 = vmax.f32 %v457_v26, 0.0  ;;  %v1007_v26 = vld [vmem:[%s3181_s3 + $0x18] sm:$0xff] }
  0x2a   : > { %350 = vst.msk [vmem:[#allocation2 + $0x160] sm:$0x3] %vm307_vm1, %v2308_v0  ;;  %353 = vst.msk [vmem:[#allocation2 + $0x178] sm:$0x3] %vm307_vm1, %v2308_v0  ;;  %v423_v41 = vmul.f32 %v2523_v1, %v384_v24  ;;  %v486_v54 = vmax.f32 %v454_v27, 0.0  ;;  %v428_v58 = vmul.f32 %v2523_v1, %v389_v43  ;;  %v491_v4 = vmax.f32 %v459_v36, 0.0 }
  0x2b   : > { %351 = vst.msk [vmem:[#allocation2 + $0x168] sm:$0xff] %vm304_vm0, %v2308_v0  ;;  %352 = vst.msk [vmem:[#allocation2 + $0x170] sm:$0xff] %vm304_vm0, %v2308_v0  ;;  %v461_v48 = vadd.f32 %v2533_v2, %v422_v37  ;;  %v464_v49 = vadd.f32 %v2533_v2, %v425_v39  ;;  %v465_v55 = vadd.f32 %v2533_v2, %v426_v40  ;;  %v1006_v27 = vld [vmem:[%s3181_s3 + $0x10] sm:$0xff]  ;;  %vm1722_vm13 = vcmask 392192  }
  0x2c   : > { %354 = vst.msk [vmem:[#allocation2 + $0x180] sm:$0xff] %vm304_vm0, %v2308_v0  ;;  %355 = vst.msk [vmem:[#allocation2 + $0x188] sm:$0xff] %vm304_vm0, %v2308_v0  ;;  %v462_v56 = vadd.f32 %v2533_v2, %v423_v41  ;;  %vm1731_vm14 = vcmask 457728   ;;  %vm1740_vm15 = vcmask 523264  }
  0x2d   : > { %356 = vst.msk [vmem:[#allocation2 + $0x190] sm:$0x3] %vm307_vm1, %v2308_v0  ;;  %v493_v6 = vmax.f32 %v461_v48, 0.0  ;;  %v497_v9 = vmax.f32 %v465_v55, 0.0 }
  0x2e   : > { %1143 = vst.msk [vmem:[#allocation3] sm:$0xff] %vm941_vm2, %v2308_v0  ;;  %1146 = vst.msk [vmem:[#allocation3 + $0x10] sm:$0xff] %vm941_vm2, %v2308_v0 }
  0x2f   : > { %1148 = vst.msk [vmem:[#allocation3 + $0x20] sm:$0xff] %vm941_vm2, %v2308_v0  ;;  %1150 = vst.msk [vmem:[#allocation3 + $0x30] sm:$0xff] %vm941_vm2, %v2308_v0 }
  0x30   : > { %1152 = vst.msk [vmem:[#allocation3 + $0x40] sm:$0xff] %vm941_vm2, %v2308_v0  ;;  %1154 = vst.msk [vmem:[#allocation3 + $0x50] sm:$0xff] %vm941_vm2, %v2308_v0 }
  0x31   : > { %1156 = vst.msk [vmem:[#allocation3 + $0x60] sm:$0xff] %vm941_vm2, %v2308_v0  ;;  %1158 = vst.msk [vmem:[#allocation3 + $0x70] sm:$0xff] %vm941_vm2, %v2308_v0 }
  0x32   : > { %1160 = vst.msk [vmem:[#allocation3 + $0x80] sm:$0xff] %vm941_vm2, %v2308_v0  ;;  %1162 = vst.msk [vmem:[#allocation3 + $0x90] sm:$0xff] %vm941_vm2, %v2308_v0 }
  0x33   : > { %505 = vst.msk [vmem:[#allocation2 + $0x31] sm:$0xff] %vm304_vm0, %v472_v28  ;;  %506 = vst.msk [vmem:[#allocation2 + $0x39] sm:$0xff] %vm304_vm0, %v473_v29  ;;  %v385_v28 = vld [vmem:[%s2528_s23 + $0xc8] sm:$0xff]  ;;  %v388_v29 = vld [vmem:[%s2528_s23 + $0xe0] sm:$0xff] }
  0x34   : > { %507 = vst.msk [vmem:[#allocation2 + $0x49] sm:$0xff] %vm304_vm0, %v474_v30  ;;  %508 = vst.msk [vmem:[#allocation2 + $0x51] sm:$0xff] %vm304_vm0, %v475_v33  ;;  %v455_v33 = vadd.f32 %v2533_v2, %v416_v20  ;;  %v424_v42 = vmul.f32 %v2523_v1, %v385_v28  ;;  %v427_v44 = vmul.f32 %v2523_v1, %v388_v29 }
  0x35   : > { %503 = vst.msk [vmem:[#allocation2 + $0x19] sm:$0xff] %vm304_vm0, %v470_v38  ;;  %504 = vst.msk [vmem:[#allocation2 + $0x21] sm:$0xff] %vm304_vm0, %v471_v45  ;;  %v460_v38 = vadd.f32 %v2533_v2, %v421_v23  ;;  %v390_v45 = vld [vmem:[%s2528_s23 + $0xf0] sm:$0xff]  ;;  %s2315_s23 = smov 28  }
  0x36   : > { %509 = vst.msk [vmem:[#allocation2 + $0x61] sm:$0xff] %vm304_vm0, %v476_v46  ;;  %510 = vst.msk [vmem:[#allocation2 + $0x69] sm:$0xff] %vm304_vm0, %v477_v47  ;;  %v485_v46 = vmax.f32 %v453_v10, 0.0  ;;  %v488_v47 = vmax.f32 %v456_v25, 0.0  ;;  %v463_v57 = vadd.f32 %v2533_v2, %v424_v42  ;;  %v429_v59 = vmul.f32 %v2523_v1, %v390_v45  ;;  %v1008_v25 = vld [vmem:[%s3181_s3 + $0x20] sm:$0xf] }
  0x37   : > { %513 = vst.msk [vmem:[#allocation2 + $0x91] sm:$0xff] %vm304_vm0, %v480_v61  ;;  %514 = vst.msk [vmem:[#allocation2 + $0x99] sm:$0xff] %vm304_vm0, %v481_v62  ;;  %v487_v60 = vmax.f32 %v455_v33, 0.0  ;;  %v490_v61 = vmax.f32 %v458_v34, 0.0  ;;  %v466_v62 = vadd.f32 %v2533_v2, %v427_v44  ;;  %v492_v5 = vmax.f32 %v460_v38, 0.0  ;;  %2109 = vmatprep.subr.msk.mxu0 %vm1034_vm3, %v1008_v25  ;;  %v1004_v33 = vld [vmem:[%s3181_s3] sm:$0xff] }
  0x38   : > { %511 = vst.msk [vmem:[#allocation2 + $0x79] sm:$0xff] %vm304_vm0, %v478_v63  ;;  %512 = vst.msk [vmem:[#allocation2 + $0x81] sm:$0xff] %vm304_vm0, %v479_v7  ;;  %v430_v63 = vmul.f32 %v2523_v1, %v391_v50  ;;  %v496_v7 = vmax.f32 %v464_v49, 0.0  ;;  %v494_v10 = vmax.f32 %v462_v56, 0.0  ;;  %v467_v1 = vadd.f32 %v2533_v2, %v428_v58  ;;  %2110 = vmatpush3.msk.msra.mxu0 %vm1034_vm3, %v1008_v25 }
  0x39   : > { %515 = vst.msk [vmem:[#allocation2 + $0xa9] sm:$0xff] %vm304_vm0, %v482_v11  ;;  %516 = vst.msk [vmem:[#allocation2 + $0xb1] sm:$0xff] %vm304_vm0, %v483_v31  ;;  %v495_v11 = vmax.f32 %v463_v57, 0.0  ;;  %v468_v12 = vadd.f32 %v2533_v2, %v429_v59  ;;  %v498_v14 = vmax.f32 %v466_v62, 0.0  ;;  %2111 = vmatprep.subr.mxu0 %v1007_v26 }
  0x3a   : > { %v569_v18 = vld [vmem:[#allocation2 + $0x32] ss:$2 sm:$0xff]  ;;  %v553_v19 = vld [vmem:[#allocation2 + $0x31] ss:$2 sm:$0xff]  ;;  %517 = vst.msk [vmem:[#allocation2 + $0xc1] sm:$0xff] %vm304_vm0, %v484_v32  ;;  %518 = vst.msk [vmem:[#allocation2 + $0xc9] sm:$0xff] %vm304_vm0, %v485_v46  ;;  %v469_v13 = vadd.f32 %v2533_v2, %v430_v63  ;;  %2112 = vmatpush3.msra.mxu0 %v1007_v26 }
  0x3b   : > { %719 = vrot.lane.b32.xlu1 %v569_v18, %s2309_s26  ;;  %687 = vrot.lane.b32.xlu0 %v553_v19, %s2310_s10  ;;  %v584_v30 = vld [vmem:[#allocation2 + $0x48] ss:$2 sm:$0xff]  ;;  %521 = vst.msk [vmem:[#allocation2 + $0xf1] sm:$0xff] %vm304_vm0, %v488_v47  ;;  %522 = vst.msk [vmem:[#allocation2 + $0xf9] sm:$0xff] %vm304_vm0, %v489_v53  ;;  %v600_v3 = vld [vmem:[#allocation2 + $0x49] ss:$2 sm:$0xff] }
  0x3c   : > { %v582_v35 = vld [vmem:[#allocation2 + $0x18] ss:$2 sm:$0xff]  ;;  %v598_v52 = vld [vmem:[#allocation2 + $0x19] ss:$2 sm:$0xff]  ;;  %519 = vst.msk [vmem:[#allocation2 + $0xd9] sm:$0xff] %vm304_vm0, %v486_v54  ;;  %520 = vst.msk [vmem:[#allocation2 + $0xe1] sm:$0xff] %vm304_vm0, %v487_v60  ;;  %2113 = vmatprep.subr.mxu0 %v1006_v27 }
  0x3d   : > { %v555_v51 = vld [vmem:[#allocation2 + $0x61] ss:$2 sm:$0xff]  ;;  %v614_v8 = vld [vmem:[#allocation2 + $0x1a] ss:$2 sm:$0xff]  ;;  %523 = vst.msk [vmem:[#allocation2 + $0x109] sm:$0xff] %vm304_vm0, %v490_v61  ;;  %524 = vst.msk [vmem:[#allocation2 + $0x111] sm:$0xff] %vm304_vm0, %v491_v4  ;;  %2114 = vmatpush3.msra.mxu0 %v1006_v27 }
  0x3e   : > { %525 = vst.msk [vmem:[#allocation2 + $0x121] sm:$0xff] %vm304_vm0, %v492_v5  ;;  %526 = vst.msk [vmem:[#allocation2 + $0x129] sm:$0xff] %vm304_vm0, %v493_v6  ;;  %v499_v15 = vmax.f32 %v467_v1, 0.0  ;;  %v500_v16 = vmax.f32 %v468_v12, 0.0  ;;  %v501_v17 = vmax.f32 %v469_v13, 0.0 }
  0x3f   : > { %751 = vrot.lane.b32.xlu1 %v584_v30, %s2311_s12  ;;  %749 = vrot.lane.b32.xlu0 %v582_v35, %s2311_s12  ;;  %529 = vst.msk [vmem:[#allocation2 + $0x151] sm:$0xff] %vm304_vm0, %v496_v7  ;;  %530 = vst.msk [vmem:[#allocation2 + $0x159] sm:$0xff] %vm304_vm0, %v497_v9  ;;  %v571_v18 = vld [vmem:[#allocation2 + $0x62] ss:$2 sm:$0xff]  ;;  %v557_v19 = vld [vmem:[#allocation2 + $0x91] ss:$2 sm:$0xff] }
  0x40   : > { %527 = vst.msk [vmem:[#allocation2 + $0x139] sm:$0xff] %vm304_vm0, %v494_v10  ;;  %528 = vst.msk [vmem:[#allocation2 + $0x141] sm:$0xff] %vm304_vm0, %v495_v11  ;;  %v630_v2 = vld [vmem:[#allocation2 + $0x30] ss:$2 sm:$0xff]  ;;  %v646_v23 = vld [vmem:[#allocation2 + $0x31] ss:$2 sm:$0xff] }
  0x41   : > { %531 = vst.msk [vmem:[#allocation2 + $0x169] sm:$0xff] %vm304_vm0, %v498_v14  ;;  %532 = vst.msk [vmem:[#allocation2 + $0x171] sm:$0xff] %vm304_vm0, %v499_v15  ;;  %v616_v20 = vld [vmem:[#allocation2 + $0x4a] ss:$2 sm:$0xff]  ;;  %v602_v28 = vld [vmem:[#allocation2 + $0x79] ss:$2 sm:$0xff] }
  0x42   : > { %533 = vst.msk [vmem:[#allocation2 + $0x181] sm:$0xff] %vm304_vm0, %v500_v16  ;;  %534 = vst.msk [vmem:[#allocation2 + $0x189] sm:$0xff] %vm304_vm0, %v501_v17  ;;  %v586_v21 = vld [vmem:[#allocation2 + $0x78] ss:$2 sm:$0xff]  ;;  %v588_v29 = vld [vmem:[#allocation2 + $0xa8] ss:$2 sm:$0xff] }
  0x43   : > { %689 = vrot.lane.b32.xlu1 %v555_v51, %s2310_s10  ;;  %781 = vrot.lane.b32.xlu0 %v598_v52, %s3187_s13  ;;  %v573_v22 = vld [vmem:[#allocation2 + $0x92] ss:$2 sm:$0xff]  ;;  %v1005_v30 = vld [vmem:[%s3181_s3 + $0x8] sm:$0xff]  ;;  %v561_v39 = vld [vmem:[#allocation2 + $0xf1] ss:$2 sm:$0xff] }
  0x44   : > { %v632_v24 = vld [vmem:[#allocation2 + $0x60] ss:$2 sm:$0xff]  ;;  %v648_v32 = vld [vmem:[#allocation2 + $0x61] ss:$2 sm:$0xff]  ;;  %2115 = vmatprep.subr.mxu0 %v1005_v30  ;;  %v634_v40 = vld [vmem:[#allocation2 + $0x90] ss:$2 sm:$0xff] }
  0x45   : > { %v662_v31 = vld [vmem:[#allocation2 + $0x32] ss:$2 sm:$0xff]  ;;  %2116 = vmatpush3.msra.mxu0 %v1005_v30  ;;  %v604_v34 = vld [vmem:[#allocation2 + $0xa9] ss:$2 sm:$0xff]  ;;  %v664_v36 = vld [vmem:[#allocation2 + $0x62] ss:$2 sm:$0xff] }
  0x46   : > { %v559_v35 = vld [vmem:[#allocation2 + $0xc1] ss:$2 sm:$0xff]  ;;  %2117 = vmatprep.subr.mxu0 %v1004_v33  ;;  %v618_v37 = vld [vmem:[#allocation2 + $0x7a] ss:$2 sm:$0xff]  ;;  %v620_v41 = vld [vmem:[#allocation2 + $0xaa] ss:$2 sm:$0xff] }
  0x47   : > { %813 = vrot.lane.b32.xlu1 %v614_v8, %s2313_s17  ;;  %783 = vrot.lane.b32.xlu0 %v600_v3, %s3187_s13  ;;  %v575_v38 = vld [vmem:[#allocation2 + $0xc2] ss:$2 sm:$0xff]  ;;  %v577_v43 = vld [vmem:[#allocation2 + $0xf2] ss:$2 sm:$0xff]  ;;  %v650_v44 = vld [vmem:[#allocation2 + $0x91] ss:$2 sm:$0xff] }
  0x48   : > { %2118 = vmatpush3.msra.mxu0 %v1004_v33  ;;  %v590_v42 = vld [vmem:[#allocation2 + $0xd8] ss:$2 sm:$0xff]  ;;  %v606_v46 = vld [vmem:[#allocation2 + $0xd9] ss:$2 sm:$0xff]  ;;  %v592_v47 = vld [vmem:[#allocation2 + $0x108] ss:$2 sm:$0xff] }
  0x49   : > { %v636_v45 = vld [vmem:[#allocation2 + $0xc0] ss:$2 sm:$0xff]  ;;  %v652_v49 = vld [vmem:[#allocation2 + $0xc1] ss:$2 sm:$0xff]  ;;  %v565_v55 = vld [vmem:[#allocation2 + $0x151] ss:$2 sm:$0xff] }
  0x4a   : > { %v666_v48 = vld [vmem:[#allocation2 + $0x92] ss:$2 sm:$0xff]  ;;  %v608_v50 = vld [vmem:[#allocation2 + $0x109] ss:$2 sm:$0xff]  ;;  %v668_v52 = vld [vmem:[#allocation2 + $0xc2] ss:$2 sm:$0xff] }
  0x4b   : > { %721 = vrot.lane.b32.xlu1 %v571_v18, %s2309_s26  ;;  %691 = vrot.lane.b32.xlu0 %v557_v19, %s2310_s10  ;;  %v563_v51 = vld [vmem:[#allocation2 + $0x121] ss:$2 sm:$0xff]  ;;  %v622_v53 = vld [vmem:[#allocation2 + $0xda] ss:$2 sm:$0xff]  ;;  %v624_v57 = vld [vmem:[#allocation2 + $0x10a] ss:$2 sm:$0xff] }
  0x4c   : > { %v579_v54 = vld [vmem:[#allocation2 + $0x122] ss:$2 sm:$0xff]  ;;  %v581_v59 = vld [vmem:[#allocation2 + $0x152] ss:$2 sm:$0xff]  ;;  %v654_v60 = vld [vmem:[#allocation2 + $0xf1] ss:$2 sm:$0xff] }
  0x4d   : > { %v638_v56 = vld [vmem:[#allocation2 + $0xf0] ss:$2 sm:$0xff]  ;;  %v640_v61 = vld [vmem:[#allocation2 + $0x120] ss:$2 sm:$0xff]  ;;  %v610_v62 = vld [vmem:[#allocation2 + $0x139] ss:$2 sm:$0xff] }
  0x4e   : > { %v594_v58 = vld [vmem:[#allocation2 + $0x138] ss:$2 sm:$0xff]  ;;  %v596_v63 = vld [vmem:[#allocation2 + $0x168] ss:$2 sm:$0xff]  ;;  %v656_v4 = vld [vmem:[#allocation2 + $0x121] ss:$2 sm:$0xff] }
  0x4f   : > { %845 = vrot.lane.b32.xlu1 %v630_v2, %s2314_s18  ;;  %815 = vrot.lane.b32.xlu0 %v616_v20, %s2313_s17  ;;  %v670_v3 = vld [vmem:[#allocation2 + $0xf2] ss:$2 sm:$0xff]  ;;  %v612_v6 = vld [vmem:[#allocation2 + $0x169] ss:$2 sm:$0xff]  ;;  %v672_v8 = vld [vmem:[#allocation2 + $0x122] ss:$2 sm:$0xff] }
  0x50   : > { %v626_v5 = vld [vmem:[#allocation2 + $0x13a] ss:$2 sm:$0xff]  ;;  %v628_v7 = vld [vmem:[#allocation2 + $0x16a] ss:$2 sm:$0xff]  ;;  %v660_v12 = vld [vmem:[#allocation2 + $0x181] ss:$2 sm:$0xff] }
  0x51   : > { %v644_v11 = vld [vmem:[#allocation2 + $0x180] ss:$2 sm:$0xff]  ;;  %v642_v1 = vld [vmem:[#allocation2 + $0x150] ss:$2 sm:$0xff]  ;;  %v658_v13 = vld [vmem:[#allocation2 + $0x151] ss:$2 sm:$0xff] }
  0x52   : > { %v676_v16 = vld [vmem:[#allocation2 + $0x182] ss:$2 sm:$0xff]  ;;  %v674_v17 = vld [vmem:[#allocation2 + $0x152] ss:$2 sm:$0xff]  ;;  %1149 = vst.msk [vmem:[#allocation3 + $0x28] sm:$0x3] %vm1144_vm11, %v2308_v0 }
  0x53   : > { %753 = vrot.lane.b32.xlu1 %v586_v21, %s2311_s12  ;;  %723 = vrot.lane.b32.xlu0 %v573_v22, %s2309_s26  ;;  %1145 = vst.msk [vmem:[#allocation3 + $0x8] sm:$0x3] %vm1144_vm11, %v2308_v0  ;;  %1147 = vst.msk [vmem:[#allocation3 + $0x18] sm:$0x3] %vm1144_vm11, %v2308_v0 }
  0x54   : > { %1151 = vst.msk [vmem:[#allocation3 + $0x38] sm:$0x3] %vm1144_vm11, %v2308_v0  ;;  %1153 = vst.msk [vmem:[#allocation3 + $0x48] sm:$0x3] %vm1144_vm11, %v2308_v0 }
  0x55   : > { %1155 = vst.msk [vmem:[#allocation3 + $0x58] sm:$0x3] %vm1144_vm11, %v2308_v0  ;;  %1157 = vst.msk [vmem:[#allocation3 + $0x68] sm:$0x3] %vm1144_vm11, %v2308_v0 }
  0x56   : > { %1159 = vst.msk [vmem:[#allocation3 + $0x78] sm:$0x3] %vm1144_vm11, %v2308_v0  ;;  %1161 = vst.msk [vmem:[#allocation3 + $0x88] sm:$0x3] %vm1144_vm11, %v2308_v0 }
  0x57   : > { %877 = vrot.lane.b32.xlu1 %v646_v23, %s2315_s23  ;;  %847 = vrot.lane.b32.xlu0 %v632_v24, %s2314_s18  ;;  %1163 = vst.msk [vmem:[#allocation3 + $0x98] sm:$0x3] %vm1144_vm11, %v2308_v0 }
  0x5b   : > { %785 = vrot.lane.b32.xlu1 %v602_v28, %s3187_s13  ;;  %755 = vrot.lane.b32.xlu0 %v588_v29, %s2311_s12  ;;  %v535_v29 = vld [vmem:[#allocation2] ss:$2 sm:$0xff] }
  0x5f   : > { %909 = vrot.lane.b32.xlu1 %v662_v31, %s2316_s24  ;;  %879 = vrot.lane.b32.xlu0 %v648_v32, %s2315_s23 }
  0x63   : > { %787 = vrot.lane.b32.xlu1 %v604_v34, %s3187_s13  ;;  %693 = vrot.lane.b32.xlu0 %v559_v35, %s2310_s10 }
  0x67   : > { %911 = vrot.lane.b32.xlu1 %v664_v36, %s2316_s24  ;;  %817 = vrot.lane.b32.xlu0 %v618_v37, %s2313_s17  ;;  %v537_v37 = vld [vmem:[#allocation2 + $0x30] ss:$2 sm:$0xff] }
  0x6b   : > { %725 = vrot.lane.b32.xlu1 %v575_v38, %s2309_s26  ;;  %695 = vrot.lane.b32.xlu0 %v561_v39, %s2310_s10 }
  0x6f   : > { %849 = vrot.lane.b32.xlu1 %v634_v40, %s2314_s18  ;;  %819 = vrot.lane.b32.xlu0 %v620_v41, %s2313_s17 }
  0x73   : > { %757 = vrot.lane.b32.xlu1 %v590_v42, %s2311_s12  ;;  %727 = vrot.lane.b32.xlu0 %v577_v43, %s2309_s26 }
  0x77   : > { %881 = vrot.lane.b32.xlu1 %v650_v44, %s2315_s23  ;;  %851 = vrot.lane.b32.xlu0 %v636_v45, %s2314_s18 }
  0x7b   : > { %789 = vrot.lane.b32.xlu1 %v606_v46, %s3187_s13  ;;  %759 = vrot.lane.b32.xlu0 %v592_v47, %s2311_s12 }
  0x7f   : > { %913 = vrot.lane.b32.xlu1 %v666_v48, %s2316_s24  ;;  %883 = vrot.lane.b32.xlu0 %v652_v49, %s2315_s23 }
  0x83   : > { %791 = vrot.lane.b32.xlu1 %v608_v50, %s3187_s13  ;;  %697 = vrot.lane.b32.xlu0 %v563_v51, %s2310_s10 }
  0x87   : > { %915 = vrot.lane.b32.xlu1 %v668_v52, %s2316_s24  ;;  %821 = vrot.lane.b32.xlu0 %v622_v53, %s2313_s17 }
  0x8b   : > { %729 = vrot.lane.b32.xlu1 %v579_v54, %s2309_s26  ;;  %699 = vrot.lane.b32.xlu0 %v565_v55, %s2310_s10  ;;  %s2317_s10 = smov 48  }
  0x8e   : > { %v686_v10 = vpop.permute.xlu0 %685 }
  0x8f   : > { %853 = vrot.lane.b32.xlu1 %v638_v56, %s2314_s18  ;;  %823 = vrot.lane.b32.xlu0 %v624_v57, %s2313_s17  ;;  %v718_v9 = vpop.permute.xlu1 %717  ;;  %v933_v30 = vsel %vm304_vm0, %v535_v29, %v686_v10 }
  0x90   : > { %v942_v33 = vsel %vm941_vm2, %v933_v30, %v718_v9 }
  0x93   : > { %761 = vrot.lane.b32.xlu1 %v594_v58, %s2311_s12  ;;  %731 = vrot.lane.b32.xlu0 %v581_v59, %s2309_s26 }
  0x97   : > { %885 = vrot.lane.b32.xlu1 %v654_v60, %s2315_s23  ;;  %855 = vrot.lane.b32.xlu0 %v640_v61, %s2314_s18 }
  0x9b   : > { %793 = vrot.lane.b32.xlu1 %v610_v62, %s3187_s13  ;;  %763 = vrot.lane.b32.xlu0 %v596_v63, %s2311_s12  ;;  %v539_v63 = vld [vmem:[#allocation2 + $0x60] ss:$2 sm:$0xff]  ;;  %s2318_s12 = smov 56  }
  0x9f   : > { %917 = vrot.lane.b32.xlu1 %v670_v3, %s2316_s24  ;;  %887 = vrot.lane.b32.xlu0 %v656_v4, %s2315_s23 }
  0xa3   : > { %825 = vrot.lane.b32.xlu1 %v626_v5, %s2313_s17  ;;  %795 = vrot.lane.b32.xlu0 %v612_v6, %s3187_s13 }
  0xa7   : > { %827 = vrot.lane.b32.xlu1 %v628_v7, %s2313_s17  ;;  %919 = vrot.lane.b32.xlu0 %v672_v8, %s2316_s24 }
  0xab   : > { %859 = vrot.lane.b32.xlu1 %v644_v11, %s2314_s18  ;;  %857 = vrot.lane.b32.xlu0 %v642_v1, %s2314_s18  ;;  %v541_v1 = vld [vmem:[#allocation2 + $0x90] ss:$2 sm:$0xff] }
  0xad   : > { %v720_v14 = vpop.permute.xlu1 %719  ;;  %v688_v15 = vpop.permute.xlu0 %687 }
  0xae   : > { %v934_v41 = vsel %vm304_vm0, %v537_v37, %v688_v15 }
  0xaf   : > { %891 = vrot.lane.b32.xlu1 %v660_v12, %s2315_s23  ;;  %889 = vrot.lane.b32.xlu0 %v658_v13, %s2315_s23  ;;  %v943_v46 = vsel %vm941_vm2, %v934_v41, %v720_v14 }
  0xb1   : > { %v752_v18 = vpop.permute.xlu1 %751  ;;  %v750_v19 = vpop.permute.xlu0 %749 }
  0xb2   : > { %v951_v34 = vsel %vm950_vm4, %v942_v33, %v750_v19  ;;  %v952_v47 = vsel %vm950_vm4, %v943_v46, %v752_v18 }
  0xb3   : > { %923 = vrot.lane.b32.xlu1 %v676_v16, %s2316_s24  ;;  %921 = vrot.lane.b32.xlu0 %v674_v17, %s2316_s24 }
  0xb5   : > { %v690_v2 = vpop.permute.xlu1 %689  ;;  %v782_v20 = vpop.permute.xlu0 %781 }
  0xb6   : > { %v960_v38 = vsel %vm959_vm5, %v951_v34, %v782_v20  ;;  %v935_v3 = vsel %vm304_vm0, %v539_v63, %v690_v2  ;;  %v543_v34 = vld [vmem:[#allocation2 + $0xc0] ss:$2 sm:$0xff]  ;;  %v549_v63 = vld [vmem:[#allocation2 + $0x150] ss:$2 sm:$0xff] }
  0xb9   : > { %v814_v21 = vpop.permute.xlu1 %813  ;;  %v784_v22 = vpop.permute.xlu0 %783 }
  0xba   : > { %v969_v39 = vsel %vm968_vm6, %v960_v38, %v814_v21  ;;  %v961_v50 = vsel %vm959_vm5, %v952_v47, %v784_v22 }
  0xbd   : > { %v722_v23 = vpop.permute.xlu1 %721  ;;  %v2764_v24 = vpop.permute.xlu0 %691 }
  0xbe   : > { %v944_v6 = vsel %vm941_vm2, %v935_v3, %v722_v23  ;;  %v936_v17 = vsel %vm304_vm0, %v541_v1, %v2764_v24 }
  0xc1   : > { %v846_v25 = vpop.permute.xlu1 %845  ;;  %v816_v26 = vpop.permute.xlu0 %815 }
  0xc2   : > { %v978_v40 = vsel %vm977_vm7, %v969_v39, %v846_v25  ;;  %v970_v51 = vsel %vm968_vm6, %v961_v50, %v816_v26 }
  0xc5   : > { %v754_v27 = vpop.permute.xlu1 %753  ;;  %v2766_v28 = vpop.permute.xlu0 %723 }
  0xc6   : > { %v953_v7 = vsel %vm950_vm4, %v944_v6, %v754_v27  ;;  %v945_v18 = vsel %vm941_vm2, %v936_v17, %v2766_v28 }
  0xc9   : > { %v878_v31 = vpop.permute.xlu1 %877  ;;  %v848_v32 = vpop.permute.xlu0 %847 }
  0xca   : > { %v987_v42 = vsel %vm986_vm8, %v978_v40, %v878_v31  ;;  %v979_v52 = vsel %vm977_vm7, %v970_v51, %v848_v32 }
  0xcd   : > { %v786_v35 = vpop.permute.xlu1 %785  ;;  %v756_v36 = vpop.permute.xlu0 %755 }
  0xce   : > { %v962_v10 = vsel %vm959_vm5, %v953_v7, %v786_v35  ;;  %v954_v19 = vsel %vm950_vm4, %v945_v18, %v756_v36 }
  0xd1   : > { %v910_v43 = vpop.permute.xlu1 %909  ;;  %v880_v44 = vpop.permute.xlu0 %879 }
  0xd2   : > { %v996_v45 = vsel %vm995_vm9, %v987_v42, %v910_v43  ;;  %v988_v53 = vsel %vm986_vm8, %v979_v52, %v880_v44  ;;  %v545_v44 = vld [vmem:[#allocation2 + $0xf0] ss:$2 sm:$0xff] }
  0xd3   : > { %2119 = vmatprep.mubr.msk.f32.mxu0 %vm1009_vm10, %v996_v45 }
  0xd5   : > { %v788_v48 = vpop.permute.xlu1 %787  ;;  %v694_v49 = vpop.permute.xlu0 %693 }
  0xd6   : > { %v963_v21 = vsel %vm959_vm5, %v954_v19, %v788_v48  ;;  %v937_v37 = vsel %vm304_vm0, %v543_v34, %v694_v49  ;;  %v1416_v19 = vld [vmem:[#allocation3 + $0x91] sm:$0xff] }
  0xd9   : > { %v912_v54 = vpop.permute.xlu1 %911  ;;  %v818_v55 = vpop.permute.xlu0 %817 }
  0xda   : > { %v997_v56 = vsel %vm995_vm9, %v988_v53, %v912_v54  ;;  %v971_v11 = vsel %vm968_vm6, %v962_v10, %v818_v55 }
  0xdb   : > { %2120 = vmatmul.mubr.msk.f32.vlgmr.msra.gmra.mxu0 %vm1009_vm10, %v997_v56 }
  0xdd   : > { %v726_v57 = vpop.permute.xlu1 %725  ;;  %v696_v58 = vpop.permute.xlu0 %695 }
  0xde   : > { %v946_v38 = vsel %vm941_vm2, %v937_v37, %v726_v57  ;;  %v938_v49 = vsel %vm304_vm0, %v545_v44, %v696_v58 }
  0xe1   : > { %v850_v59 = vpop.permute.xlu1 %849  ;;  %v820_v60 = vpop.permute.xlu0 %819 }
  0xe2   : > { %v980_v12 = vsel %vm977_vm7, %v971_v11, %v850_v59  ;;  %v972_v22 = vsel %vm968_vm6, %v963_v21, %v820_v60 }
  0xe5   : > { %v758_v61 = vpop.permute.xlu1 %757  ;;  %v728_v62 = vpop.permute.xlu0 %727 }
  0xe6   : > { %v955_v39 = vsel %vm950_vm4, %v946_v38, %v758_v61  ;;  %v947_v51 = vsel %vm941_vm2, %v938_v49, %v728_v62  ;;  %v547_v62 = vld [vmem:[#allocation2 + $0x120] ss:$2 sm:$0xff] }
  0xe9   : > { %v882_v4 = vpop.permute.xlu1 %881  ;;  %v852_v5 = vpop.permute.xlu0 %851 }
  0xea   : > { %v989_v13 = vsel %vm986_vm8, %v980_v12, %v882_v4  ;;  %v981_v23 = vsel %vm977_vm7, %v972_v22, %v852_v5  ;;  %v1368_v5 = vld [vmem:[#allocation3 + $0x2] sm:$0xff]  ;;  %v1408_v12 = vld [vmem:[#allocation3 + $0x90] sm:$0xff] }
  0xeb   : > { %1465 = vrot.lane.b32.xlu1 %v1368_v5, %s3187_s13 }
  0xed   : > { %v790_v8 = vpop.permute.xlu1 %789  ;;  %v760_v9 = vpop.permute.xlu0 %759 }
  0xee   : > { %v964_v42 = vsel %vm959_vm5, %v955_v39, %v790_v8  ;;  %v956_v52 = vsel %vm950_vm4, %v947_v51, %v760_v9 }
  0xef   : > { %1607 = vrot.lane.b32.xlu1 %v1408_v12, %s2317_s10 }
  0xf1   : > { %v914_v14 = vpop.permute.xlu1 %913  ;;  %v884_v15 = vpop.permute.xlu0 %883 }
  0xf2   : > { %v998_v16 = vsel %vm995_vm9, %v989_v13, %v914_v14  ;;  %v990_v25 = vsel %vm986_vm8, %v981_v23, %v884_v15 }
  0xf3   : > { %2122 = vmatprep.mubr.msk.f32.mxu0 %vm1009_vm10, %v998_v16  ;;  %1639 = vrot.lane.b32.xlu1 %v1416_v19, %s2318_s12 }
  0xf5   : > { %v792_v2 = vpop.permute.xlu1 %791  ;;  %v2800_v20 = vpop.permute.xlu0 %697 }
  0xf6   : > { %v965_v55 = vsel %vm959_vm5, %v956_v52, %v792_v2  ;;  %v939_v0 = vsel %vm304_vm0, %v547_v62, %v2800_v20  ;;  %v1360_v2 = vld [vmem:[#allocation3 + $0x1] sm:$0xff] }
  0xf7   : > { %1433 = vrot.lane.b32.xlu0 %v1360_v2, %s2309_s26 }
  0xf9   : > { %v916_v26 = vpop.permute.xlu1 %915  ;;  %v822_v24 = vpop.permute.xlu0 %821 }
  0xfa   : > { %v999_v27 = vsel %vm995_vm9, %v990_v25, %v916_v26  ;;  %v973_v43 = vsel %vm968_vm6, %v964_v42, %v822_v24  ;;  %v2862_v24 = vld [vmem:[%s3182_s4] ss:$0 sm:$0xff] }
  0xfb   : > { %2123 = vmatmul.mubr.msk.f32.gmra.mxu0 %vm1009_vm10, %v999_v27 }
  0xfd   : > { %v730_v28 = vpop.permute.xlu1 %729  ;;  %v700_v29 = vpop.permute.xlu0 %699 }
  0xfe   : > { %v940_v6 = vsel %vm304_vm0, %v549_v63, %v700_v29  ;;  %v948_v7 = vsel %vm941_vm2, %v939_v0, %v730_v28  ;;  %v2867_v28 = vld [vmem:[%s3183_s5] ss:$0 sm:$0xff]  ;;  %v1217_v0 = vld [vmem:[#allocation2 + $0x139] ss:$2 sm:$0xff] }
 0x101   : > { %v854_v30 = vpop.permute.xlu1 %853  ;;  %v824_v31 = vpop.permute.xlu0 %823 }
 0x102   : > { %v982_v45 = vsel %vm977_vm7, %v973_v43, %v854_v30  ;;  %v974_v56 = vsel %vm968_vm6, %v965_v55, %v824_v31  ;;  %v1211_v55 = vld [vmem:[#allocation2 + $0x19] ss:$2 sm:$0xff] }
 0x103   : > { %2133 = vmatprep.mubr.msk.f32.mxu1 %vm304_vm0, %v1211_v55 }
 0x105   : > { %v762_v32 = vpop.permute.xlu1 %761  ;;  %v732_v33 = vpop.permute.xlu0 %731 }
 0x106   : > { %v949_v8 = vsel %vm941_vm2, %v940_v6, %v732_v33  ;;  %v957_v9 = vsel %vm950_vm4, %v948_v7, %v762_v32  ;;  %v1218_v6 = vld [vmem:[#allocation2 + $0x169] ss:$2 sm:$0xff] }
 0x109   : > { %v886_v35 = vpop.permute.xlu1 %885  ;;  %v856_v36 = vpop.permute.xlu0 %855 }
 0x10a   : > { %v991_v46 = vsel %vm986_vm8, %v982_v45, %v886_v35  ;;  %v983_v57 = vsel %vm977_vm7, %v974_v56, %v856_v36  ;;  %v1212_v56 = vld [vmem:[#allocation2 + $0x49] ss:$2 sm:$0xff] }
 0x10d   : > { %v794_v40 = vpop.permute.xlu1 %793  ;;  %v764_v41 = vpop.permute.xlu0 %763 }
 0x10e   : > { %v958_v10 = vsel %vm950_vm4, %v949_v8, %v764_v41  ;;  %v966_v13 = vsel %vm959_vm5, %v957_v9, %v794_v40 }
 0x111   : > { %v918_v47 = vpop.permute.xlu1 %917  ;;  %v888_v48 = vpop.permute.xlu0 %887 }
 0x112   : > { %v1000_v50 = vsel %vm995_vm9, %v991_v46, %v918_v47  ;;  %v992_v58 = vsel %vm986_vm8, %v983_v57, %v888_v48 }
 0x113   : > { %2125 = vmatprep.mubr.msk.f32.mxu0 %vm1009_vm10, %v1000_v50 }
 0x115   : > { %v826_v53 = vpop.permute.xlu1 %825  ;;  %v796_v54 = vpop.permute.xlu0 %795 }
 0x116   : > { %v967_v14 = vsel %vm959_vm5, %v958_v10, %v796_v54  ;;  %v975_v15 = vsel %vm968_vm6, %v966_v13, %v826_v53  ;;  %v1219_v54 = vld [vmem:[%s3185_s7] sm:$0xf] }
 0x117   : > { %2131 = vmatprep.subr.msk.mxu1 %vm1034_vm3, %v1219_v54 }
 0x118   : > { %2132 = vmatpush3.msk.msra.mxu1 %vm1034_vm3, %v1219_v54 }
 0x119   : > { %v828_v59 = vpop.permute.xlu1 %827  ;;  %v920_v60 = vpop.permute.xlu0 %919  ;;  %2134 = vmatmul.mubr.msk.f32.vlgmr.msra.gmra.mxu1 %vm304_vm0, %v1212_v56 }
 0x11a   : > { %v1001_v61 = vsel %vm995_vm9, %v992_v58, %v920_v60  ;;  %v976_v16 = vsel %vm968_vm6, %v967_v14, %v828_v59  ;;  %v1213_v58 = vld [vmem:[#allocation2 + $0x79] ss:$2 sm:$0xff]  ;;  %v1214_v59 = vld [vmem:[#allocation2 + $0xa9] ss:$2 sm:$0xff] }
 0x11b   : > { %2126 = vmatmul.mubr.msk.f32.gmra.mxu0 %vm1009_vm10, %v1001_v61  ;;  %2136 = vmatprep.mubr.msk.f32.mxu1 %vm304_vm0, %v1213_v58  ;;  %v1215_v60 = vld [vmem:[#allocation2 + $0xd9] ss:$2 sm:$0xff]  ;;  %v1216_v61 = vld [vmem:[#allocation2 + $0x109] ss:$2 sm:$0xff] }
 0x11d   : > { %v860_v3 = vpop.permute.xlu1 %859  ;;  %v858_v4 = vpop.permute.xlu0 %857  ;;  %2137 = vmatmul.mubr.msk.f32.gmra.mxu1 %vm304_vm0, %v1214_v59  ;;  %v1352_v59 = vld [vmem:[#allocation3] sm:$0xff] }
 0x11e   : > { %v985_v17 = vsel %vm977_vm7, %v976_v16, %v860_v3  ;;  %v984_v18 = vsel %vm977_vm7, %v975_v15, %v858_v4  ;;  %2139 = vmatprep.mubr.msk.f32.mxu1 %vm304_vm0, %v1215_v60 }
 0x121   : > { %v892_v11 = vpop.permute.xlu1 %891  ;;  %v890_v1 = vpop.permute.xlu0 %889  ;;  %2140 = vmatmul.mubr.msk.f32.gmra.mxu1 %vm304_vm0, %v1216_v61 }
 0x122   : > { %v994_v20 = vsel %vm986_vm8, %v985_v17, %v892_v11  ;;  %v993_v21 = vsel %vm986_vm8, %v984_v18, %v890_v1  ;;  %2142 = vmatprep.mubr.msk.f32.mxu1 %vm304_vm0, %v1217_v0 }
 0x125   : > { %v924_v22 = vpop.permute.xlu1 %923  ;;  %v922_v23 = vpop.permute.xlu0 %921  ;;  %2143 = vmatmul.mubr.msk.f32.gmra.mxu1 %vm304_vm0, %v1218_v6  ;;  %vm1758_vm0 = vcmask 588800  }
 0x126   : > { %v1003_v25 = vsel %vm995_vm9, %v994_v20, %v924_v22  ;;  %v1002_v26 = vsel %vm995_vm9, %v993_v21, %v922_v23  ;;  %v1757_v20 = vld [vmem:[%s3184_s6 + $0x40] sm:$0xff]  ;;  %v1756_v22 = vld [vmem:[%s3184_s6 + $0x38] sm:$0xff]  ;;  %v1755_v23 = vld [vmem:[%s3184_s6 + $0x30] sm:$0xff] }
 0x127   : > { %2128 = vmatprep.mubr.msk.f32.mxu0 %vm1009_vm10, %v1002_v26  ;;  %2175 = vmatprep.subr.mxu1 %v1757_v20  ;;  %v1754_v26 = vld [vmem:[%s3184_s6 + $0x28] sm:$0xff] }
 0x128   : > { %2129 = vmatmul.mubr.msk.f32.gmra.mxu0 %vm1009_vm10, %v1003_v25  ;;  %2145 = vmatprep.subr.mxu0 %v1757_v20 }
 0x129   : > { %2184 = vmatpush3.msra.mxu1 %v1757_v20  ;;  %2146 = vmatpush3.msra.mxu0 %v1757_v20 }
 0x12a   : > { %2176 = vmatprep.subr.mxu1 %v1756_v22  ;;  %2147 = vmatprep.subr.mxu0 %v1756_v22 }
 0x12b   : > { %2185 = vmatpush3.msra.mxu1 %v1756_v22  ;;  %2148 = vmatpush3.msra.mxu0 %v1756_v22 }
 0x12c   : > { %2177 = vmatprep.subr.mxu1 %v1755_v23  ;;  %2149 = vmatprep.subr.mxu0 %v1755_v23 }
 0x12d   : > { %2186 = vmatpush3.msra.mxu1 %v1755_v23  ;;  %2150 = vmatpush3.msra.mxu0 %v1755_v23 }
 0x12e   : > { %2178 = vmatprep.subr.mxu1 %v1754_v26  ;;  %2151 = vmatprep.subr.mxu0 %v1754_v26 }
 0x12f   : > { %2187 = vmatpush3.msra.mxu1 %v1754_v26  ;;  %2152 = vmatpush3.msra.mxu0 %v1754_v26 }
 0x19b   : > { %v2121_v27 = vpop.f32.mrf.mxu0 }
 0x19c   : > { %v1172_v29 = vmul.f32 %v2121_v27, %v2862_v24 }
 0x19d   : > { %v1104_v30 = vpop.f32.mrf.mxu0 }
 0x19e   : > { %v1187_v31 = vadd.f32 %v2867_v28, %v1172_v29  ;;  %v1171_v32 = vmul.f32 %v2862_v24, %v1104_v30  ;;  %v1751_v30 = vld [vmem:[%s3184_s6 + $0x10] sm:$0xff] }
 0x1a0   : > { %v1195_v33 = vmax.f32 %v1187_v31, 0.0  ;;  %v1186_v34 = vadd.f32 %v2867_v28, %v1171_v32  ;;  %v1750_v31 = vld [vmem:[%s3184_s6 + $0x8] sm:$0xff] }
 0x1a2   : > { %1204 = vst.msk [vmem:[#allocation3 + $0x21] sm:$0xff] %vm941_vm2, %v1195_v33  ;;  %v1194_v35 = vmax.f32 %v1186_v34, 0.0  ;;  %v1749_v33 = vld [vmem:[%s3184_s6] sm:$0xff] }
 0x1a4   : > { %1203 = vst.msk [vmem:[#allocation3 + $0x11] sm:$0xff] %vm941_vm2, %v1194_v35  ;;  %v1466_v35 = vpop.permute.xlu1 %1465 }
 0x1a9   : > { %v2875_v36 = vld [vmem:[#allocation3 + $0x20] sm:$0xff] }
 0x1aa   : > { %v1362_v37 = vld [vmem:[#allocation3 + $0x21] sm:$0xff]  ;;  %1499 = vrot.lane.b32.xlu1 %v2875_v36, %s2314_s18 }
 0x1ab   : > { %1437 = vrot.lane.b32.xlu0 %v1362_v37, %s2309_s26  ;;  %v1370_v38 = vld [vmem:[#allocation3 + $0x22] sm:$0xff]  ;;  %v1361_v39 = vld [vmem:[#allocation3 + $0x11] sm:$0xff] }
 0x1ac   : > { %v1369_v40 = vld [vmem:[#allocation3 + $0x12] sm:$0xff] }
 0x1ad   : > { %v2887_v41 = vld [vmem:[#allocation3 + $0x10] sm:$0xff] }
 0x1ae   : > { %1531 = vrot.lane.b32.xlu1 %v1362_v37, %s2316_s24 }
 0x1af   : > { %1469 = vrot.lane.b32.xlu0 %v1370_v38, %s3187_s13 }
 0x1b2   : > { %1435 = vrot.lane.b32.xlu1 %v1361_v39, %s2309_s26 }
 0x1b3   : > { %1563 = vrot.lane.b32.xlu0 %v1370_v38, %s2319_s20 }
 0x1b6   : > { %1467 = vrot.lane.b32.xlu1 %v1369_v40, %s3187_s13 }
 0x1b7   : > { %1593 = vrot.lane.b32.xlu0 %v2875_v36, %s2317_s10 }
 0x1ba   : > { %1497 = vrot.lane.b32.xlu1 %v2887_v41, %s2314_s18 }
 0x1bb   : > { %1625 = vrot.lane.b32.xlu0 %v1362_v37, %s2318_s12  ;;  %v2124_v42 = vpop.f32.mrf.mxu0  ;;  %v3007_v37 = vpop.permute.xlu1 %1607 }
 0x1bc   : > { %v1174_v43 = vmul.f32 %v2124_v42, %v2862_v24  ;;  %v1434_v42 = vpop.permute.xlu0 %1433 }
 0x1bd   : > { %v1114_v44 = vpop.f32.mrf.mxu0 }
 0x1be   : > { %v1189_v45 = vadd.f32 %v2867_v28, %v1174_v43  ;;  %v1173_v46 = vmul.f32 %v2862_v24, %v1114_v44  ;;  %1529 = vrot.lane.b32.xlu1 %v1361_v39, %s2316_s24  ;;  %v1424_v44 = vld [vmem:[#allocation3 + $0x92] sm:$0xff] }
 0x1bf   : > { %1657 = vrot.lane.b32.xlu0 %v1370_v38, %s2320_s21 }
 0x1c0   : > { %v1197_v47 = vmax.f32 %v1189_v45, 0.0  ;;  %v1188_v48 = vadd.f32 %v2867_v28, %v1173_v46 }
 0x1c2   : > { %1206 = vst.msk [vmem:[#allocation3 + $0x41] sm:$0xff] %vm941_vm2, %v1197_v47  ;;  %v1196_v50 = vmax.f32 %v1188_v48, 0.0  ;;  %1561 = vrot.lane.b32.xlu1 %v1369_v40, %s2319_s20  ;;  %v3016_v40 = vpop.permute.xlu1 %1639 }
 0x1c4   : > { %1205 = vst.msk [vmem:[#allocation3 + $0x31] sm:$0xff] %vm941_vm2, %v1196_v50 }
 0x1c9   : > { %v1387_v49 = vld [vmem:[#allocation3 + $0x41] sm:$0xff] }
 0x1ca   : > { %v2901_v51 = vld [vmem:[#allocation3 + $0x40] sm:$0xff]  ;;  %1535 = vrot.lane.b32.xlu0 %v1387_v49, %s2316_s24 }
 0x1cb   : > { %1503 = vrot.lane.b32.xlu1 %v2901_v51, %s2314_s18  ;;  %v1395_v52 = vld [vmem:[#allocation3 + $0x42] sm:$0xff]  ;;  %v2908_v53 = vld [vmem:[#allocation3 + $0x30] sm:$0xff] }
 0x1cc   : > { %v1386_v57 = vld [vmem:[#allocation3 + $0x31] sm:$0xff] }
 0x1cd   : > { %v2941_v10 = vld [vmem:[#allocation3 + $0x32] sm:$0xff] }
 0x1ce   : > { %1567 = vrot.lane.b32.xlu0 %v1395_v52, %s2319_s20 }
 0x1cf   : > { %1441 = vrot.lane.b32.xlu1 %v1387_v49, %s2309_s26 }
 0x1d2   : > { %1501 = vrot.lane.b32.xlu0 %v2908_v53, %s2314_s18 }
 0x1d3   : > { %1473 = vrot.lane.b32.xlu1 %v1395_v52, %s3187_s13 }
 0x1d6   : > { %1533 = vrot.lane.b32.xlu0 %v1386_v57, %s2316_s24 }
 0x1d7   : > { %1597 = vrot.lane.b32.xlu1 %v2901_v51, %s2317_s10 }
 0x1da   : > { %1595 = vrot.lane.b32.xlu0 %v2908_v53, %s2317_s10 }
 0x1db   : > { %1629 = vrot.lane.b32.xlu1 %v1387_v49, %s2318_s12  ;;  %v2127_v62 = vpop.f32.mrf.mxu0 }
 0x1dc   : > { %v1176_v63 = vmul.f32 %v2127_v62, %v2862_v24  ;;  %v1681_v62 = vsel %vm941_vm2, %v1352_v59, %v1434_v42 }
 0x1dd   : > { %v1124_v3 = vpop.f32.mrf.mxu0 }
 0x1de   : > { %v1191_v4 = vadd.f32 %v2867_v28, %v1176_v63  ;;  %v1175_v5 = vmul.f32 %v2862_v24, %v1124_v3  ;;  %1627 = vrot.lane.b32.xlu0 %v1386_v57, %s2318_s12  ;;  %v1689_v3 = vsel %vm959_vm5, %v1681_v62, %v1466_v35 }
 0x1df   : > { %1661 = vrot.lane.b32.xlu1 %v1395_v52, %s2320_s21 }
 0x1e0   : > { %v1199_v7 = vmax.f32 %v1191_v4, 0.0  ;;  %v1190_v8 = vadd.f32 %v2867_v28, %v1175_v5 }
 0x1e2   : > { %1208 = vst.msk [vmem:[#allocation3 + $0x61] sm:$0xff] %vm941_vm2, %v1199_v7  ;;  %v1198_v9 = vmax.f32 %v1190_v8, 0.0 }
 0x1e3   : > { %1439 = vrot.lane.b32.xlu1 %v1386_v57, %s2309_s26 }
 0x1e4   : > { %1207 = vst.msk [vmem:[#allocation3 + $0x51] sm:$0xff] %vm941_vm2, %v1198_v9 }
 0x1e7   : > { %1471 = vrot.lane.b32.xlu1 %v2941_v10, %s3187_s13 }
 0x1e8   : > { %v2130_v11 = vpop.f32.mrf.mxu0 }
 0x1e9   : > { %v1178_v1 = vmul.f32 %v2130_v11, %v2862_v24  ;;  %v2946_v12 = vld [vmem:[#allocation3 + $0x60] sm:$0xff] }
 0x1ea   : > { %1507 = vrot.lane.b32.xlu0 %v2946_v12, %s2314_s18  ;;  %v1134_v13 = vpop.f32.mrf.mxu0  ;;  %v1389_v18 = vld [vmem:[#allocation3 + $0x61] sm:$0xff] }
 0x1eb   : > { %1565 = vrot.lane.b32.xlu1 %v2941_v10, %s2319_s20  ;;  %v1193_v14 = vadd.f32 %v2867_v28, %v1178_v1  ;;  %v1177_v15 = vmul.f32 %v2862_v24, %v1134_v13  ;;  %v1374_v2 = vld [vmem:[#allocation3 + $0x62] sm:$0xff]  ;;  %v2964_v21 = vld [vmem:[#allocation3 + $0x50] sm:$0xff] }
 0x1ec   : > { %v1388_v25 = vld [vmem:[#allocation3 + $0x51] sm:$0xff] }
 0x1ed   : > { %v1201_v16 = vmax.f32 %v1193_v14, 0.0  ;;  %v1192_v17 = vadd.f32 %v2867_v28, %v1177_v15  ;;  %v1753_v24 = vld [vmem:[%s3184_s6 + $0x20] sm:$0xff]  ;;  %v1752_v28 = vld [vmem:[%s3184_s6 + $0x18] sm:$0xff] }
 0x1ee   : > { %1539 = vrot.lane.b32.xlu0 %v1389_v18, %s2316_s24  ;;  %v1396_v27 = vld [vmem:[#allocation3 + $0x52] sm:$0xff]  ;;  %2179 = vmatprep.subr.mxu1 %v1753_v24 }
 0x1ef   : > { %1445 = vrot.lane.b32.xlu1 %v1389_v18, %s2309_s26  ;;  %1210 = vst.msk [vmem:[#allocation3 + $0x81] sm:$0xff] %vm941_vm2, %v1201_v16  ;;  %v1200_v19 = vmax.f32 %v1192_v17, 0.0  ;;  %2153 = vmatprep.subr.mxu0 %v1753_v24 }
 0x1f0   : > { %2188 = vmatpush3.msra.mxu1 %v1753_v24  ;;  %2154 = vmatpush3.msra.mxu0 %v1753_v24 }
 0x1f1   : > { %1209 = vst.msk [vmem:[#allocation3 + $0x71] sm:$0xff] %vm941_vm2, %v1200_v19  ;;  %2180 = vmatprep.subr.mxu1 %v1752_v28  ;;  %2155 = vmatprep.subr.mxu0 %v1752_v28 }
 0x1f2   : > { %1477 = vrot.lane.b32.xlu0 %v1374_v2, %s3187_s13  ;;  %2189 = vmatpush3.msra.mxu1 %v1752_v28 }
 0x1f3   : > { %1571 = vrot.lane.b32.xlu1 %v1374_v2, %s2319_s20  ;;  %2156 = vmatpush3.msra.mxu0 %v1752_v28 }
 0x1f4   : > { %2181 = vmatprep.subr.mxu1 %v1751_v30  ;;  %2157 = vmatprep.subr.mxu0 %v1751_v30 }
 0x1f5   : > { %2190 = vmatpush3.msra.mxu1 %v1751_v30  ;;  %2158 = vmatpush3.msra.mxu0 %v1751_v30 }
 0x1f6   : > { %1601 = vrot.lane.b32.xlu0 %v2946_v12, %s2317_s10  ;;  %v1399_v29 = vld [vmem:[#allocation3 + $0x82] sm:$0xff]  ;;  %2182 = vmatprep.subr.mxu1 %v1750_v31 }
 0x1f7   : > { %1505 = vrot.lane.b32.xlu1 %v2964_v21, %s2314_s18  ;;  %v1407_v32 = vld [vmem:[#allocation3 + $0x80] sm:$0xff]  ;;  %2159 = vmatprep.subr.mxu0 %v1750_v31 }
 0x1f8   : > { %2191 = vmatpush3.msra.mxu1 %v1750_v31  ;;  %2160 = vmatpush3.msra.mxu0 %v1750_v31  ;;  %v1415_v34 = vld [vmem:[#allocation3 + $0x81] sm:$0xff]  ;;  %v3009_v38 = vld [vmem:[#allocation3 + $0x70] sm:$0xff] }
 0x1f9   : > { %2183 = vmatprep.subr.mxu1 %v1749_v33  ;;  %2161 = vmatprep.subr.mxu0 %v1749_v33  ;;  %v1414_v39 = vld [vmem:[#allocation3 + $0x71] sm:$0xff] }
 0x1fa   : > { %1633 = vrot.lane.b32.xlu0 %v1389_v18, %s2318_s12  ;;  %2192 = vmatpush3.msra.mxu1 %v1749_v33  ;;  %v1422_v43 = vld [vmem:[#allocation3 + $0x72] sm:$0xff] }
 0x1fb   : > { %1537 = vrot.lane.b32.xlu1 %v1388_v25, %s2316_s24  ;;  %2162 = vmatpush3.msra.mxu0 %v1749_v33 }
 0x1fe   : > { %1665 = vrot.lane.b32.xlu0 %v1374_v2, %s2320_s21 }
 0x1ff   : > { %1569 = vrot.lane.b32.xlu1 %v1396_v27, %s2319_s20 }
 0x202   : > { %1443 = vrot.lane.b32.xlu0 %v1388_v25, %s2309_s26 }
 0x203   : > { %1575 = vrot.lane.b32.xlu1 %v1399_v29, %s2319_s20 }
 0x206   : > { %1475 = vrot.lane.b32.xlu0 %v1396_v27, %s3191_s22 }
 0x207   : > { %1605 = vrot.lane.b32.xlu1 %v1407_v32, %s2317_s10 }
 0x20a   : > { %1599 = vrot.lane.b32.xlu0 %v2964_v21, %s2317_s10 }
 0x20b   : > { %1637 = vrot.lane.b32.xlu1 %v1415_v34, %s2318_s12 }
 0x20e   : > { %1631 = vrot.lane.b32.xlu0 %v1388_v25, %s2318_s12 }
 0x20f   : > { %1669 = vrot.lane.b32.xlu1 %v1399_v29, %s2320_s21 }
 0x212   : > { %1663 = vrot.lane.b32.xlu0 %v1396_v27, %s2320_s21 }
 0x213   : > { %1603 = vrot.lane.b32.xlu1 %v3009_v38, %s2317_s10 }
 0x216   : > { %1511 = vrot.lane.b32.xlu0 %v1407_v32, %s2314_s18 }
 0x217   : > { %1635 = vrot.lane.b32.xlu1 %v1414_v39, %s2318_s12  ;;  %s2069_s12 = sshll.u32 %s2389_s9, 10 }
 0x218   : > { %s3127_s13 = scalar_lea.hbm %s3186_s8, %s2069_s12 }
 0x21a   : > { %1543 = vrot.lane.b32.xlu0 %v1415_v34, %s2316_s24 }
 0x21b   : > { %1667 = vrot.lane.b32.xlu1 %v1422_v43, %s2320_s21 }
 0x21c   : > { %v1500_v45 = vpop.permute.xlu1 %1499 }
 0x21d   : > { %v1438_v46 = vpop.permute.xlu0 %1437 }
 0x21e   : > { %1447 = vrot.lane.b32.xlu0 %v1414_v39, %s2309_s26  ;;  %v1683_v27 = vsel %vm941_vm2, %v2875_v36, %v1438_v46 }
 0x21f   : > { %1671 = vrot.lane.b32.xlu1 %v1424_v44, %s2320_s21 }
 0x220   : > { %v1532_v47 = vpop.permute.xlu1 %1531 }
 0x221   : > { %v1470_v48 = vpop.permute.xlu0 %1469 }
 0x222   : > { %1479 = vrot.lane.b32.xlu0 %v1422_v43, %s3191_s22  ;;  %v1691_v28 = vsel %vm959_vm5, %v1683_v27, %v1470_v48  ;;  %s2321_s22 = smov [#allocation4]  }
 0x223   : > { %s2250_s17 = sshll.u32 %s2321_s22, 4  ;;  %s2251_s17 = int_to_ptr.vmem [resolvable:$false] %s2250_s17 }
 0x224   : > { %v1436_v50 = vpop.permute.xlu1 %1435  ;;  %s2252_s23 = scalar_lea.vmem %s2251_s17, 2048 }
 0x225   : > { %v1564_v49 = vpop.permute.xlu0 %1563  ;;  %v1682_v52 = vsel %vm941_vm2, %v2887_v41, %v1436_v50 }
 0x226   : > { %1509 = vrot.lane.b32.xlu0 %v3009_v38, %s2314_s18  ;;  %s296_s18 = sand.u32 1, %s2298_s28  }
 0x227   : > { %s3137_s9 = scalar_lea.sflag [#allocation5], %s296_s18 }
 0x228   : > { %v1468_v54 = vpop.permute.xlu1 %1467 }
 0x229   : > { %v1690_v55 = vsel %vm959_vm5, %v1682_v52, %v1468_v54  ;;  %v1594_v57 = vpop.permute.xlu0 %1593 }
 0x22a   : > { %v1698_v56 = vsel %vm977_vm7, %v1690_v55, %v1500_v45  ;;  %1541 = vrot.lane.b32.xlu0 %v1414_v39, %s2316_s24  ;;  %s2030_s24 = sshll.u32 %s296_s18, 6 }
 0x22b   : > { %v1706_v58 = vsel %vm995_vm9, %v1698_v56, %v1532_v47  ;;  %s298_s10 = scalar_lea.vmem [#allocation4], %s2030_s24 }
 0x22c   : > { %v1498_v60 = vpop.permute.xlu1 %1497  ;;  %v1715_v61 = vsel %vm1713_vm12, %v1706_v58, %v1564_v49 }
 0x22d   : > { %v1626_v63 = vpop.permute.xlu0 %1625  ;;  %v1697_v4 = vsel %vm977_vm7, %v1689_v3, %v1498_v60 }
 0x22e   : > { %1573 = vrot.lane.b32.xlu0 %v1422_v43, %s2319_s20  ;;  %s1918_s20 = sshll.u32 %s298_s10, 4  ;;  %s3131_s20 = int_to_ptr.vmem [resolvable:$true] %s1918_s20 }
 0x22f   : > { %s2246_s19 = scalar_lea.vmem %s3131_s20, 1024  ;;  %p2253_p0 = scmp.lt.s32.totalorder %s3131_s20, %s2251_s17 }
 0x230   : > { %v1530_v41 = vpop.permute.xlu1 %1529  ;;  %p2247_p11 = scmp.ne.s32.totalorder %s3131_s20, %s2246_s19  ;;  %p2254_p1 = scmp.lt.s32.totalorder %s2252_s23, %s2246_s19 }
 0x231   : > { %v1705_v5 = vsel %vm995_vm9, %v1697_v4, %v1530_v41  ;;  %v1658_v8 = vpop.permute.xlu0 %1657 }
 0x232   : > { %1659 = vrot.lane.b32.xlu0 %v2941_v10, %s2320_s21  ;;  %p2248_p12 = pnand %p2247_p11, %p2406_p5  ;;  %p2255_p2 = por %p2254_p1, %p2253_p0 }
 0x234   : > { %v1562_v0 = vpop.permute.xlu1 %1561  ;;  %p2249_p13 = pneg %p2248_p12 }
 0x235   : > { %v1714_v6 = vsel %vm1713_vm12, %v1705_v5, %v1562_v0 }
 0x236   : > { %v1723_v7 = vsel %vm1722_vm13, %v1714_v6, %v1594_v57  ;;  %p2256_p3 = pnand %p2255_p2, %p2249_p13 }
 0x237   : > { %v1732_v9 = vsel %vm1731_vm14, %v1723_v7, %v1626_v63 }
 0x238   : > { %v1741_v11 = vsel %vm1740_vm15, %v1732_v9, %v1658_v8 }
 0x239   : > { %2163 = vmatprep.mubr.msk.f32.mxu0 %vm1758_vm0, %v1741_v11 }
 0x23c   : > { %v1536_v1 = vpop.permute.xlu0 %1535 }
 0x23d   : > { %v1504_v10 = vpop.permute.xlu1 %1503 }
 0x240   : > { %v1568_v14 = vpop.permute.xlu0 %1567 }
 0x241   : > { %v1442_v13 = vpop.permute.xlu1 %1441 }
 0x242   : > { %v1685_v58 = vsel %vm941_vm2, %v2901_v51, %v1442_v13 }
 0x244   : > { %v1502_v16 = vpop.permute.xlu0 %1501 }
 0x245   : > { %v1474_v15 = vpop.permute.xlu1 %1473  ;;  %v1699_v29 = vsel %vm977_vm7, %v1691_v28, %v1502_v16 }
 0x246   : > { %v1693_v60 = vsel %vm959_vm5, %v1685_v58, %v1474_v15 }
 0x248   : > { %v1534_v18 = vpop.permute.xlu0 %1533 }
 0x249   : > { %v1598_v17 = vpop.permute.xlu1 %1597  ;;  %v1707_v30 = vsel %vm995_vm9, %v1699_v29, %v1534_v18 }
 0x24c   : > { %v1596_v2 = vpop.permute.xlu0 %1595 }
 0x24d   : > { %v1630_v19 = vpop.permute.xlu1 %1629  ;;  %v1724_v20 = vsel %vm1722_vm13, %v1715_v61, %v1596_v2 }
 0x250   : > { %v1628_v23 = vpop.permute.xlu0 %1627 }
 0x251   : > { %v1662_v22 = vpop.permute.xlu1 %1661  ;;  %v3046_v25 = vsel %vm1731_vm14, %v1724_v20, %v1628_v23 }
 0x255   : > { %v1440_v26 = vpop.permute.xlu1 %1439 }
 0x256   : > { %v1684_v55 = vsel %vm941_vm2, %v2908_v53, %v1440_v26 }
 0x259   : > { %v1472_v24 = vpop.permute.xlu1 %1471 }
 0x25a   : > { %v1692_v59 = vsel %vm959_vm5, %v1684_v55, %v1472_v24 }
 0x25b   : > { %v1700_v62 = vsel %vm977_vm7, %v1692_v59, %v1504_v10 }
 0x25c   : > { %v1508_v32 = vpop.permute.xlu0 %1507  ;;  %v1708_v53 = vsel %vm995_vm9, %v1700_v62, %v1536_v1 }
 0x25d   : > { %v1566_v31 = vpop.permute.xlu1 %1565  ;;  %v1717_v8 = vsel %vm1713_vm12, %v1708_v53, %v1568_v14 }
 0x25e   : > { %v1716_v33 = vsel %vm1713_vm12, %v1707_v30, %v1566_v31 }
 0x25f   : > { %v1725_v34 = vsel %vm1722_vm13, %v1716_v33, %v1598_v17 }
 0x260   : > { %v1734_v35 = vsel %vm1731_vm14, %v1725_v34, %v1630_v19  ;;  %v1540_v42 = vpop.permute.xlu0 %1539 }
 0x261   : > { %v3056_v39 = vpop.permute.xlu1 %1445  ;;  %v1743_v43 = vsel %vm1740_vm15, %v1734_v35, %v1662_v22 }
 0x262   : > { %2166 = vmatprep.mubr.msk.f32.mxu1 %vm1758_vm0, %v1743_v43  ;;  %v1687_v35 = vsel %vm941_vm2, %v2946_v12, %v3056_v39 }
 0x264   : > { %v1478_v44 = vpop.permute.xlu0 %1477 }
 0x265   : > { %v1572_v36 = vpop.permute.xlu1 %1571 }
 0x268   : > { %v1602_v46 = vpop.permute.xlu0 %1601 }
 0x269   : > { %v1506_v45 = vpop.permute.xlu1 %1505 }
 0x26a   : > { %v1701_v61 = vsel %vm977_vm7, %v1693_v60, %v1506_v45 }
 0x26c   : > { %v1634_v48 = vpop.permute.xlu0 %1633 }
 0x26d   : > { %v1538_v47 = vpop.permute.xlu1 %1537 }
 0x26e   : > { %v1709_v41 = vsel %vm995_vm9, %v1701_v61, %v1538_v47 }
 0x270   : > { %v1666_v49 = vpop.permute.xlu0 %1665 }
 0x271   : > { %v1570_v50 = vpop.permute.xlu1 %1569 }
 0x272   : > { %v1718_v4 = vsel %vm1713_vm12, %v1709_v41, %v1570_v50 }
 0x273   : > { %v1727_v5 = vsel %vm1722_vm13, %v1718_v4, %v1602_v46 }
 0x274   : > { %v1444_v54 = vpop.permute.xlu0 %1443  ;;  %v1736_v9 = vsel %vm1731_vm14, %v1727_v5, %v1634_v48 }
 0x275   : > { %v1576_v52 = vpop.permute.xlu1 %1575  ;;  %v1686_v51 = vsel %vm941_vm2, %v2964_v21, %v1444_v54  ;;  %v1745_v21 = vsel %vm1740_vm15, %v1736_v9, %v1666_v49 }
 0x278   : > { %v1476_v57 = vpop.permute.xlu0 %1475 }
 0x279   : > { %v1606_v56 = vpop.permute.xlu1 %1605  ;;  %v1694_v7 = vsel %vm959_vm5, %v1686_v51, %v1476_v57 }
 0x27a   : > { %v1702_v10 = vsel %vm977_vm7, %v1694_v7, %v1508_v32 }
 0x27b   : > { %v1710_v17 = vsel %vm995_vm9, %v1702_v10, %v1540_v42  ;;  %v1695_v42 = vsel %vm959_vm5, %v1687_v35, %v1478_v44 }
 0x27c   : > { %v1600_v3 = vpop.permute.xlu0 %1599  ;;  %v1719_v19 = vsel %vm1713_vm12, %v1710_v17, %v1572_v36 }
 0x27d   : > { %v1638_v63 = vpop.permute.xlu1 %1637  ;;  %v1726_v11 = vsel %vm1722_vm13, %v1717_v8, %v1600_v3 }
 0x280   : > { %v1632_v6 = vpop.permute.xlu0 %1631 }
 0x281   : > { %v1670_v0 = vpop.permute.xlu1 %1669  ;;  %v1735_v13 = vsel %vm1731_vm14, %v1726_v11, %v1632_v6 }
 0x284   : > { %v1664_v15 = vpop.permute.xlu0 %1663 }
 0x285   : > { %v1604_v1 = vpop.permute.xlu1 %1603  ;;  %v1744_v16 = vsel %vm1740_vm15, %v1735_v13, %v1664_v15 }
 0x286   : > { %2167 = vmatmul.mubr.msk.f32.vlgmr.msra.gmra.mxu1 %vm1758_vm0, %v1744_v16  ;;  %v1728_v2 = vsel %vm1722_vm13, %v1719_v19, %v1604_v1 }
 0x287   : > { %2169 = vmatprep.mubr.msk.f32.mxu1 %vm1758_vm0, %v1745_v21 }
 0x288   : > { %v1512_v18 = vpop.permute.xlu0 %1511 }
 0x289   : > { %v1636_v14 = vpop.permute.xlu1 %1635 }
 0x28a   : > { %v1737_v20 = vsel %vm1731_vm14, %v1728_v2, %v1636_v14 }
 0x28c   : > { %v1544_v23 = vpop.permute.xlu0 %1543 }
 0x28d   : > { %v1668_v22 = vpop.permute.xlu1 %1667 }
 0x28e   : > { %v1746_v26 = vsel %vm1740_vm15, %v1737_v20, %v1668_v22 }
 0x28f   : > { %2170 = vmatmul.mubr.msk.f32.gmra.mxu1 %vm1758_vm0, %v1746_v26 }
 0x290   : > { %v1448_v24 = vpop.permute.xlu0 %1447 }
 0x291   : > { %v1688_v27 = vsel %vm941_vm2, %v3009_v38, %v1448_v24  ;;  %v1672_v47 = vpop.permute.xlu1 %1671 }
 0x294   : > { %v1480_v28 = vpop.permute.xlu0 %1479 }
 0x295   : > { %v1696_v29 = vsel %vm959_vm5, %v1688_v27, %v1480_v28 }
 0x296   : > { %v1704_v30 = vsel %vm977_vm7, %v1696_v29, %v1512_v18 }
 0x297   : > { %v1712_v32 = vsel %vm995_vm9, %v1704_v30, %v1544_v23 }
 0x298   : > { %v1510_v31 = vpop.permute.xlu0 %1509  ;;  %v1721_v33 = vsel %vm1713_vm12, %v1712_v32, %v1576_v52 }
 0x299   : > { %v1703_v43 = vsel %vm977_vm7, %v1695_v42, %v1510_v31  ;;  %v1730_v38 = vsel %vm1722_vm13, %v1721_v33, %v3007_v37 }
 0x29a   : > { %v1739_v48 = vsel %vm1731_vm14, %v1730_v38, %v3016_v40  ;;  %v2135_v40 = vpop.f32.mrf.mxu1 }
 0x29b   : > { %v1748_v37 = vsel %vm1740_vm15, %v1739_v48, %v1672_v47 }
 0x29c   : > { %v1542_v34 = vpop.permute.xlu0 %1541  ;;  %v1313_v52 = vpop.f32.mrf.mxu1 }
 0x29d   : > { %v1711_v36 = vsel %vm995_vm9, %v1703_v43, %v1542_v34 }
 0x29e   : > { %v2138_v54 = vpop.f32.mrf.mxu1 }
 0x2a0   : > { %v1574_v45 = vpop.permute.xlu0 %1573  ;;  %v1323_v55 = vpop.f32.mrf.mxu1 }
 0x2a1   : > { %v1720_v46 = vsel %vm1713_vm12, %v1711_v36, %v1574_v45 }
 0x2a2   : > { %v1729_v50 = vsel %vm1722_vm13, %v1720_v46, %v1606_v56  ;;  %v2141_v56 = vpop.f32.mrf.mxu1 }
 0x2a3   : > { %v1738_v12 = vsel %vm1731_vm14, %v1729_v50, %v1638_v63 }
 0x2a4   : > { %v1660_v39 = vpop.permute.xlu0 %1659  ;;  %v1747_v44 = vsel %vm1740_vm15, %v1738_v12, %v1670_v0  ;;  %v1333_v57 = vpop.f32.mrf.mxu1 }
 0x2a5   : > { %v1742_v49 = vsel %vm1740_vm15, %v3046_v25, %v1660_v39  ;;  %2172 = vmatprep.mubr.msk.f32.mxu1 %vm1758_vm0, %v1747_v44 }
 0x2a6   : > { %2164 = vmatmul.mubr.msk.f32.vlgmr.msra.gmra.mxu0 %vm1758_vm0, %v1742_v49  ;;  %2173 = vmatmul.mubr.msk.f32.gmra.mxu1 %vm1758_vm0, %v1748_v37  ;;  %v2144_v58 = vpop.f32.mrf.mxu1 }
 0x2a8   : > { %v1343_v59 = vpop.f32.mrf.mxu1 }
 0x346   : > { %v2168_v60 = vpop.f32.mrf.mxu1 }
 0x347   : > { %v1891_v25 = vadd.f32 %v2168_v60, %v2138_v54 }
 0x348   : > { %v1859_v61 = vpop.f32.mrf.mxu1 }
 0x349   : > { %1899 = vst.msk [vmem:[%s298_s10 + $0x18] sm:$0xff] %vm941_vm2, %v1891_v25  ;;  %v1890_v62 = vadd.f32 %v1859_v61, %v1323_v55 }
 0x34b   : > { %1898 = vst.msk [vmem:[%s298_s10 + $0x10] sm:$0xff] %vm941_vm2, %v1890_v62 }
 0x34f   : > { %v2171_v41 = vpop.f32.mrf.mxu1 }
 0x350   : > { %v1893_v63 = vadd.f32 %v2171_v41, %v2141_v56 }
 0x351   : > { %v1869_v3 = vpop.f32.mrf.mxu1 }
 0x352   : > { %1901 = vst.msk [vmem:[%s298_s10 + $0x28] sm:$0xff] %vm941_vm2, %v1893_v63  ;;  %v1892_v4 = vadd.f32 %v1869_v3, %v1333_v57 }
 0x354   : > { %1900 = vst.msk [vmem:[%s298_s10 + $0x20] sm:$0xff] %vm941_vm2, %v1892_v4 }
 0x366   : > { %v2165_v53 = vpop.f32.mrf.mxu0  ;;  %v2174_v5 = vpop.f32.mrf.mxu1 }
 0x367   : > { %v1889_v51 = vadd.f32 %v2165_v53, %v2135_v40  ;;  %v1895_v0 = vadd.f32 %v2174_v5, %v2144_v58 }
 0x368   : > { %v1849_v6 = vpop.f32.mrf.mxu0  ;;  %v1879_v7 = vpop.f32.mrf.mxu1 }
 0x369   : > { %1897 = vst.msk [vmem:[%s298_s10 + $0x8] sm:$0xff] %vm941_vm2, %v1889_v51  ;;  %1903 = vst.msk [vmem:[%s298_s10 + $0x38] sm:$0xff] %vm941_vm2, %v1895_v0  ;;  %v1888_v8 = vadd.f32 %v1849_v6, %v1313_v52  ;;  %v1894_v9 = vadd.f32 %v1879_v7, %v1343_v59 }
 0x36b   : > { %1896 = vst.msk [vmem:[%s298_s10] sm:$0xff] %vm941_vm2, %v1888_v8  ;;  %1902 = vst.msk [vmem:[%s298_s10 + $0x30] sm:$0xff] %vm941_vm2, %v1894_v9 }
 0x36c   : > { %2259 = shalt.err (!%p2256_p3)
}
 0x36d   : > { %s2260_s18 = scalar_lea.hbm %s3127_s13, 1024  ;;  %s2264_s12 = scalar_lea.hbm %s3186_s8, 2048 }
 0x36e   : > { %p2261_p4 = scmp.ne.s32.totalorder %s3127_s13, %s2260_s18  ;;  %p2265_p9 = scmp.lt.s32.totalorder %s3127_s13, %s3186_s8 }
 0x36f   : > { %p2266_p10 = scmp.lt.s32.totalorder %s2264_s12, %s2260_s18 }
 0x370   : > { %p2262_p7 = pnand %p2261_p4, %p2406_p5 }
 0x371   : > { %p2267_p11 = por %p2266_p10, %p2265_p9 }
 0x372   : > { %p2263_p8 = pneg %p2262_p7 }
 0x374   : > { %p2268_p12 = pnand %p2267_p11, %p2263_p8 }
 0x376   : > { %2271 = shalt.err (!%p2268_p12)
}
 0x377   : > { %s2322_s19 = smov 128  }
 0x378   : > { %2193 = dma.vmem_to_hbm [thread:$0]  (%p2406_p5), %s3131_s20, 1024, %s3127_s13, %s3137_s9, %s2322_s19, %s2322_s19, %s2309_s26  }
 0x379 PF: > { %p2199_p13 = scmp.ge.s32.totalorder %s2306_s30, 2  ;;  %s1933_s22 = sand.u32 1, %s2294_s27  }
 0x37a   : > { %s1934_s17 = scalar_lea.sflag [#allocation5], %s1933_s22 }
 0x37b   : > { %p2196_p0 = pnand %p2199_p13, %p2410_p6 }
 0x37d   : > { %p2197_p1 = pneg %p2196_p0 }
 0x37f   : > { %2289 = dma.done.wait (%p2197_p1), %s1934_s17, 1024  }
 0x380   : > { %2291 = vsyncadd (%p2197_p1), %s1934_s17, 4294966272  ;;  %p18_p2 = scmp.ge.s32.totalorder %s2393_s11, 4   ;;  %s3192_s27 = smov %s2298_s28 }
 0x381   : > { %s3193_s28 = smov %s2302_s29  ;;  %s3194_s29 = smov %s2404_s14 }
 0x382   : > { %s3195_s30 = smov %s2393_s11  ;;  %20 = sbr.rel (!%p18_p2) target bundleno = 3 (0x3), region = 160 }
 0x387   :  { %1939 = vsyncpa [#allocation5], 1 }
 0x388   :  { %1941 = vsyncpa [#allocation5 + $0x1], 1 }

</bundles_post_ra>
